<compile_context>
chip_gen: v5e
topology: v5e:2x2
jax: 0.10.0
libtpu: 0.0.40
codegen_flags: <defaults>
</compile_context>

<pallas_src>
import jax
import jax.numpy as jnp
from jax import lax
from jax.experimental import pallas as pl
from jax.experimental.pallas import tpu as pltpu

F_IN = 5            # node feature dim (mlp = nn.Linear(2*5, 5))
F_PAD = 128         # lane-padded feature dim
NEG = -3.0e38       # "-inf" sentinel for the masked max (Python float -> inlined literal)
NEG_HALF = -1.5e38  # isolated-node test threshold


def edgeconv_kernel(x_ref, src_ref, tgt_ref, w_ref, b_ref, out_ref):
    # x_ref   : (Np, F_PAD)      f32 node features, zero padded
    # src_ref : (Ep, 1)          i32 source node id per edge (padded edges: 0)
    # tgt_ref : (Ep, 1)          i32 target node id per edge (padded edges: -1 -> never selected)
    # w_ref   : (F_PAD, 2*F_PAD) [ (W1-W2)^T | W2^T ], zero padded
    # b_ref   : (1, F_PAD)
    # out_ref : (Np, F_PAD)
    n_nodes = out_ref.shape[0]          # multiple of 8
    n_edges = src_ref.shape[0]          # multiple of 8
    k_pad = max(F_PAD, ((2 * n_nodes + F_PAD - 1) // F_PAD) * F_PAD)

    x = x_ref[...]
    # One 256-lane-wide projection matmul (per-node work hoisted out of the per-edge path):
    #   p[:, :128]  = x @ (W1 - W2)^T   (applied to x_i = target node)
    #   p[:, 128:]  = x @ W2^T          (applied to x_j = source node)
    p = jnp.dot(x, w_ref[...], preferred_element_type=jnp.float32)       # (Np, 2*F_PAD)
    p_tgt = p[:, :F_PAD] + b_ref[...]   # bias folded onto the unique target row of each edge
    p_src = p[:, F_PAD:]

    # Fused one-hot gather: msg = A @ P with A[e, tgt[e]] = 1 and A[e, Np + src[e]] = 1.
    src = src_ref[...]                                                    # (Ep, 1)
    tgt = tgt_ref[...]                                                    # (Ep, 1)
    iota = lax.broadcasted_iota(jnp.int32, (n_edges, k_pad), 1)           # (Ep, k_pad)
    a = jnp.logical_or(iota == tgt, iota == (src + n_nodes)).astype(jnp.float32)

    pad_rows = k_pad - 2 * n_nodes
    pieces = [p_tgt, p_src]
    if pad_rows:
        pieces.append(jnp.zeros((pad_rows, F_PAD), jnp.float32))
    p_stack = jnp.concatenate(pieces, axis=0)                             # (k_pad, F_PAD)

    msg = jnp.dot(a, p_stack, preferred_element_type=jnp.float32)         # (Ep, F_PAD)

    # Scatter-max over the target node (aggr='max'), 8 nodes per unmasked (8,128) store.
    for g in range(n_nodes // 8):
        rows = []
        for k in range(8):
            node = g * 8 + k
            cand = jnp.where(tgt == node, msg, NEG)                       # (Ep, F_PAD)
            rows.append(jnp.max(cand, axis=0, keepdims=True))             # (1, F_PAD)
        blk = jnp.concatenate(rows, axis=0)                               # (8, F_PAD)
        # Nodes with no incoming edge get 0 (matches PyG max-aggregation fill).
        out_ref[pl.ds(g * 8, 8), :] = jnp.where(blk > NEG_HALF, blk, 0.0)


def edgeconv_blk(x, edge_index, edge_f, edge_attr, w, b):
    """x: (N, 5) float, edge_index: (2, E) int, w: (5, 10), b: (5,). Returns (N, 5)."""
    del edge_f, edge_attr   # unused by the PyTorch forward
    n, f = x.shape
    assert f == F_IN
    e = edge_index.shape[1]
    np_ = max(8, ((n + 7) // 8) * 8)        # sublane-aligned node count
    ep = max(8, ((e + 7) // 8) * 8)         # sublane-aligned edge count

    x_pad = jnp.zeros((np_, F_PAD), jnp.float32).at[:n, :f].set(x.astype(jnp.float32))

    src = edge_index[0].astype(jnp.int32)
    tgt = edge_index[1].astype(jnp.int32)
    src_col = jnp.zeros((ep, 1), jnp.int32).at[:e, 0].set(src)
    tgt_col = jnp.full((ep, 1), -1, jnp.int32).at[:e, 0].set(tgt)   # padded edges match no node

    # PyTorch Linear(10, 5): w is (out=5, in=10); split into the block acting on x_i (target)
    # and the block acting on (x_j - x_i). Packed 256-lane-wide: [ (W1-W2)^T | W2^T ].
    w = w.astype(jnp.float32)
    w1 = w[:, :F_IN]          # acts on x_i
    w2 = w[:, F_IN:]          # acts on (x_j - x_i)
    w_comb = jnp.zeros((F_PAD, 2 * F_PAD), jnp.float32)
    w_comb = w_comb.at[:F_IN, :F_IN].set((w1 - w2).T)
    w_comb = w_comb.at[:F_IN, F_PAD:F_PAD + F_IN].set(w2.T)
    b_pad = jnp.zeros((1, F_PAD), jnp.float32).at[0, :F_IN].set(b.astype(jnp.float32))

    out_pad = pl.pallas_call(
        edgeconv_kernel,
        out_shape=jax.ShapeDtypeStruct((np_, F_PAD), jnp.float32),
        in_specs=[pl.BlockSpec(memory_space=pltpu.MemorySpace.VMEM)] * 5,
        out_specs=pl.BlockSpec(memory_space=pltpu.MemorySpace.VMEM),
        compiler_params=pltpu.CompilerParams(vmem_limit_bytes=32 * 1024 * 1024),
    )(x_pad, src_col, tgt_col, w_comb, b_pad)

    return out_pad[:n, :F_IN]


def edgeconv_reference(x, edge_index, w, b):
    """Pure-JAX reference matching PyG EdgeConv(nn=Linear(10,5), aggr='max') semantics."""
    src = edge_index[0]
    tgt = edge_index[1]
    x_i = x[tgt]                                   # target (central) node
    x_j = x[src]                                   # source (neighbor) node
    msg = jnp.concatenate([x_i, x_j - x_i], axis=-1) @ w.T + b
    out = jnp.full((x.shape[0], w.shape[0]), -jnp.inf, jnp.float32)
    out = out.at[tgt].max(msg)
    return jnp.where(jnp.isneginf(out), 0.0, out)  # isolated nodes -> 0


if __name__ == "__main__":
    key = jax.random.PRNGKey(0)
    k_x, k_src, k_tgt, k_w, k_b = jax.random.split(key, 5)

    num_nodes, num_edges = 16, 48
    x = jax.random.normal(k_x, (num_nodes, F_IN), jnp.float32)
    src = jax.random.randint(k_src, (num_edges,), 0, num_nodes, jnp.int32)
    tgt = jax.random.randint(k_tgt, (num_edges,), 0, num_nodes, jnp.int32)
    edge_index = jnp.stack([src, tgt], axis=0)
    edge_f = jnp.zeros((num_edges, 1), jnp.float32)      # unused by forward
    edge_attr = jnp.zeros((num_edges, 1), jnp.float32)   # unused by forward

    scale = 1.0 / jnp.sqrt(jnp.float32(2 * F_IN))        # PyTorch Linear init range
    w = jax.random.uniform(k_w, (F_IN, 2 * F_IN), jnp.float32, -scale, scale)
    b = jax.random.uniform(k_b, (F_IN,), jnp.float32, -scale, scale)

    out = edgeconv_blk(x, edge_index, edge_f, edge_attr, w, b)
    out = jax.block_until_ready(out)

    out_ref = jax.block_until_ready(edgeconv_reference(x, edge_index, w, b))
    assert out.shape == (num_nodes, F_IN)
    assert jnp.allclose(out, out_ref, atol=1e-5, rtol=1e-5)

    print("KERNEL_OK")
</pallas_src>

<mosaic_0001>
module attributes {stable_mosaic.version = 11 : i64} {
  func.func @edgeconv_kernel(%arg0: memref<16x128xf32, #tpu.memory_space<vmem>>, %arg1: memref<48x1xi32, #tpu.memory_space<vmem>>, %arg2: memref<48x1xi32, #tpu.memory_space<vmem>>, %arg3: memref<128x256xf32, #tpu.memory_space<vmem>>, %arg4: memref<1x128xf32, #tpu.memory_space<vmem>>, %arg5: memref<16x128xf32, #tpu.memory_space<vmem>>) attributes {dimension_semantics = [], scalar_prefetch = 0 : i64, scratch_operands = 0 : i64, tpu.core_type = #tpu.core_type<tc>} {
    %c0 = arith.constant 0 : index
    %c0_0 = arith.constant 0 : index
    %0 = vector.load %arg0[%c0, %c0_0] : memref<16x128xf32, #tpu.memory_space<vmem>>, vector<16x128xf32>
    %c0_1 = arith.constant 0 : index
    %c0_2 = arith.constant 0 : index
    %1 = vector.load %arg3[%c0_1, %c0_2] : memref<128x256xf32, #tpu.memory_space<vmem>>, vector<128x256xf32>
    %cst = arith.constant dense<0.000000e+00> : vector<16x256xf32>
    %2 = tpu.matmul %0, %1, %cst {dimension_numbers = #tpu.dot_dimension_numbers<[1], [0], [0], [1], [0, 0, 1, 1], [], []>} : vector<16x128xf32>, vector<128x256xf32>, vector<16x256xf32> -> vector<16x256xf32>
    %3 = vector.extract_strided_slice %2 {offsets = [0, 0], sizes = [16, 128], strides = [1, 1]} : vector<16x256xf32> to vector<16x128xf32>
    %c0_3 = arith.constant 0 : index
    %c0_4 = arith.constant 0 : index
    %4 = vector.load %arg4[%c0_3, %c0_4] : memref<1x128xf32, #tpu.memory_space<vmem>>, vector<1x128xf32>
    %5 = vector.broadcast %4 : vector<1x128xf32> to vector<16x128xf32>
    %6 = arith.addf %3, %5 : vector<16x128xf32>
    %7 = vector.extract_strided_slice %2 {offsets = [0, 128], sizes = [16, 128], strides = [1, 1]} : vector<16x256xf32> to vector<16x128xf32>
    %c0_5 = arith.constant 0 : index
    %c0_6 = arith.constant 0 : index
    %8 = vector.load %arg1[%c0_5, %c0_6] : memref<48x1xi32, #tpu.memory_space<vmem>>, vector<48x1xi32>
    %c0_7 = arith.constant 0 : index
    %c0_8 = arith.constant 0 : index
    %9 = vector.load %arg2[%c0_7, %c0_8] : memref<48x1xi32, #tpu.memory_space<vmem>>, vector<48x1xi32>
    %10 = tpu.iota {dimensions = array<i32: 1>} : vector<48x128xi32>
    %11 = vector.broadcast %9 : vector<48x1xi32> to vector<48x128xi32>
    %12 = arith.cmpi eq, %10, %11 : vector<48x128xi32>
    %c16_i32 = arith.constant 16 : i32
    %13 = vector.broadcast %c16_i32 : i32 to vector<48x1xi32>
    %14 = arith.addi %8, %13 : vector<48x1xi32>
    %15 = vector.broadcast %14 : vector<48x1xi32> to vector<48x128xi32>
    %16 = arith.cmpi eq, %10, %15 : vector<48x128xi32>
    %17 = arith.ori %12, %16 : vector<48x128xi1>
    %18 = arith.extui %17 : vector<48x128xi1> to vector<48x128xi32>
    %19 = arith.sitofp %18 : vector<48x128xi32> to vector<48x128xf32>
    %cst_9 = arith.constant 0.000000e+00 : f32
    %20 = vector.broadcast %cst_9 : f32 to vector<96x128xf32>
    %21 = tpu.concatenate %6, %7, %20 in 0 : vector<16x128xf32>, vector<16x128xf32>, vector<96x128xf32> -> vector<128x128xf32>
    %cst_10 = arith.constant dense<0.000000e+00> : vector<48x128xf32>
    %22 = tpu.matmul %19, %21, %cst_10 {dimension_numbers = #tpu.dot_dimension_numbers<[1], [0], [0], [1], [0, 0, 1, 1], [], []>} : vector<48x128xf32>, vector<128x128xf32>, vector<48x128xf32> -> vector<48x128xf32>
    %c0_i32 = arith.constant 0 : i32
    %23 = vector.broadcast %c0_i32 : i32 to vector<48x1xi32>
    %24 = arith.cmpi eq, %9, %23 : vector<48x1xi32>
    %cst_11 = arith.constant -3.000000e+38 : f32
    %25 = vector.shape_cast %24 : vector<48x1xi1> to vector<48x1xi1>
    %26 = vector.broadcast %25 : vector<48x1xi1> to vector<48x128xi1>
    %27 = vector.broadcast %cst_11 : f32 to vector<48x128xf32>
    %28 = arith.select %26, %22, %27 : vector<48x128xi1>, vector<48x128xf32>
    %cst_12 = arith.constant dense<0xFF800000> : vector<128xf32>
    %29 = vector.multi_reduction <maximumf>, %28, %cst_12 [0] : vector<48x128xf32> to vector<128xf32>
    %30 = vector.shape_cast %29 : vector<128xf32> to vector<1x128xf32>
    %c1_i32 = arith.constant 1 : i32
    %31 = vector.broadcast %c1_i32 : i32 to vector<48x1xi32>
    %32 = arith.cmpi eq, %9, %31 : vector<48x1xi32>
    %cst_13 = arith.constant -3.000000e+38 : f32
    %33 = vector.shape_cast %32 : vector<48x1xi1> to vector<48x1xi1>
    %34 = vector.broadcast %33 : vector<48x1xi1> to vector<48x128xi1>
    %35 = vector.broadcast %cst_13 : f32 to vector<48x128xf32>
    %36 = arith.select %34, %22, %35 : vector<48x128xi1>, vector<48x128xf32>
    %cst_14 = arith.constant dense<0xFF800000> : vector<128xf32>
    %37 = vector.multi_reduction <maximumf>, %36, %cst_14 [0] : vector<48x128xf32> to vector<128xf32>
    %38 = vector.shape_cast %37 : vector<128xf32> to vector<1x128xf32>
    %c2_i32 = arith.constant 2 : i32
    %39 = vector.broadcast %c2_i32 : i32 to vector<48x1xi32>
    %40 = arith.cmpi eq, %9, %39 : vector<48x1xi32>
    %cst_15 = arith.constant -3.000000e+38 : f32
    %41 = vector.shape_cast %40 : vector<48x1xi1> to vector<48x1xi1>
    %42 = vector.broadcast %41 : vector<48x1xi1> to vector<48x128xi1>
    %43 = vector.broadcast %cst_15 : f32 to vector<48x128xf32>
    %44 = arith.select %42, %22, %43 : vector<48x128xi1>, vector<48x128xf32>
    %cst_16 = arith.constant dense<0xFF800000> : vector<128xf32>
    %45 = vector.multi_reduction <maximumf>, %44, %cst_16 [0] : vector<48x128xf32> to vector<128xf32>
    %46 = vector.shape_cast %45 : vector<128xf32> to vector<1x128xf32>
    %c3_i32 = arith.constant 3 : i32
    %47 = vector.broadcast %c3_i32 : i32 to vector<48x1xi32>
    %48 = arith.cmpi eq, %9, %47 : vector<48x1xi32>
    %cst_17 = arith.constant -3.000000e+38 : f32
    %49 = vector.shape_cast %48 : vector<48x1xi1> to vector<48x1xi1>
    %50 = vector.broadcast %49 : vector<48x1xi1> to vector<48x128xi1>
    %51 = vector.broadcast %cst_17 : f32 to vector<48x128xf32>
    %52 = arith.select %50, %22, %51 : vector<48x128xi1>, vector<48x128xf32>
    %cst_18 = arith.constant dense<0xFF800000> : vector<128xf32>
    %53 = vector.multi_reduction <maximumf>, %52, %cst_18 [0] : vector<48x128xf32> to vector<128xf32>
    %54 = vector.shape_cast %53 : vector<128xf32> to vector<1x128xf32>
    %c4_i32 = arith.constant 4 : i32
    %55 = vector.broadcast %c4_i32 : i32 to vector<48x1xi32>
    %56 = arith.cmpi eq, %9, %55 : vector<48x1xi32>
    %cst_19 = arith.constant -3.000000e+38 : f32
    %57 = vector.shape_cast %56 : vector<48x1xi1> to vector<48x1xi1>
    %58 = vector.broadcast %57 : vector<48x1xi1> to vector<48x128xi1>
    %59 = vector.broadcast %cst_19 : f32 to vector<48x128xf32>
    %60 = arith.select %58, %22, %59 : vector<48x128xi1>, vector<48x128xf32>
    %cst_20 = arith.constant dense<0xFF800000> : vector<128xf32>
    %61 = vector.multi_reduction <maximumf>, %60, %cst_20 [0] : vector<48x128xf32> to vector<128xf32>
    %62 = vector.shape_cast %61 : vector<128xf32> to vector<1x128xf32>
    %c5_i32 = arith.constant 5 : i32
    %63 = vector.broadcast %c5_i32 : i32 to vector<48x1xi32>
    %64 = arith.cmpi eq, %9, %63 : vector<48x1xi32>
    %cst_21 = arith.constant -3.000000e+38 : f32
    %65 = vector.shape_cast %64 : vector<48x1xi1> to vector<48x1xi1>
    %66 = vector.broadcast %65 : vector<48x1xi1> to vector<48x128xi1>
    %67 = vector.broadcast %cst_21 : f32 to vector<48x128xf32>
    %68 = arith.select %66, %22, %67 : vector<48x128xi1>, vector<48x128xf32>
    %cst_22 = arith.constant dense<0xFF800000> : vector<128xf32>
    %69 = vector.multi_reduction <maximumf>, %68, %cst_22 [0] : vector<48x128xf32> to vector<128xf32>
    %70 = vector.shape_cast %69 : vector<128xf32> to vector<1x128xf32>
    %c6_i32 = arith.constant 6 : i32
    %71 = vector.broadcast %c6_i32 : i32 to vector<48x1xi32>
    %72 = arith.cmpi eq, %9, %71 : vector<48x1xi32>
    %cst_23 = arith.constant -3.000000e+38 : f32
    %73 = vector.shape_cast %72 : vector<48x1xi1> to vector<48x1xi1>
    %74 = vector.broadcast %73 : vector<48x1xi1> to vector<48x128xi1>
    %75 = vector.broadcast %cst_23 : f32 to vector<48x128xf32>
    %76 = arith.select %74, %22, %75 : vector<48x128xi1>, vector<48x128xf32>
    %cst_24 = arith.constant dense<0xFF800000> : vector<128xf32>
    %77 = vector.multi_reduction <maximumf>, %76, %cst_24 [0] : vector<48x128xf32> to vector<128xf32>
    %78 = vector.shape_cast %77 : vector<128xf32> to vector<1x128xf32>
    %c7_i32 = arith.constant 7 : i32
    %79 = vector.broadcast %c7_i32 : i32 to vector<48x1xi32>
    %80 = arith.cmpi eq, %9, %79 : vector<48x1xi32>
    %cst_25 = arith.constant -3.000000e+38 : f32
    %81 = vector.shape_cast %80 : vector<48x1xi1> to vector<48x1xi1>
    %82 = vector.broadcast %81 : vector<48x1xi1> to vector<48x128xi1>
    %83 = vector.broadcast %cst_25 : f32 to vector<48x128xf32>
    %84 = arith.select %82, %22, %83 : vector<48x128xi1>, vector<48x128xf32>
    %cst_26 = arith.constant dense<0xFF800000> : vector<128xf32>
    %85 = vector.multi_reduction <maximumf>, %84, %cst_26 [0] : vector<48x128xf32> to vector<128xf32>
    %86 = vector.shape_cast %85 : vector<128xf32> to vector<1x128xf32>
    %87 = tpu.concatenate %30, %38, %46, %54, %62, %70, %78, %86 in 0 : vector<1x128xf32>, vector<1x128xf32>, vector<1x128xf32>, vector<1x128xf32>, vector<1x128xf32>, vector<1x128xf32>, vector<1x128xf32>, vector<1x128xf32> -> vector<8x128xf32>
    %cst_27 = arith.constant -1.500000e+38 : f32
    %88 = vector.broadcast %cst_27 : f32 to vector<8x128xf32>
    %89 = arith.cmpf ogt, %87, %88 : vector<8x128xf32>
    %cst_28 = arith.constant 0.000000e+00 : f32
    %90 = vector.broadcast %cst_28 : f32 to vector<8x128xf32>
    %91 = arith.select %89, %87, %90 : vector<8x128xi1>, vector<8x128xf32>
    %c0_29 = arith.constant 0 : index
    %c0_30 = arith.constant 0 : index
    %92 = vector.load %arg5[%c0_29, %c0_30] : memref<16x128xf32, #tpu.memory_space<vmem>>, vector<8x128xf32>
    tpu.vector_store %arg5[%c0_29, %c0_30], %91 {strides = array<i32>} : memref<16x128xf32, #tpu.memory_space<vmem>>, vector<8x128xf32>,
    %c8_i32 = arith.constant 8 : i32
    %93 = vector.broadcast %c8_i32 : i32 to vector<48x1xi32>
    %94 = arith.cmpi eq, %9, %93 : vector<48x1xi32>
    %cst_31 = arith.constant -3.000000e+38 : f32
    %95 = vector.shape_cast %94 : vector<48x1xi1> to vector<48x1xi1>
    %96 = vector.broadcast %95 : vector<48x1xi1> to vector<48x128xi1>
    %97 = vector.broadcast %cst_31 : f32 to vector<48x128xf32>
    %98 = arith.select %96, %22, %97 : vector<48x128xi1>, vector<48x128xf32>
    %cst_32 = arith.constant dense<0xFF800000> : vector<128xf32>
    %99 = vector.multi_reduction <maximumf>, %98, %cst_32 [0] : vector<48x128xf32> to vector<128xf32>
    %100 = vector.shape_cast %99 : vector<128xf32> to vector<1x128xf32>
    %c9_i32 = arith.constant 9 : i32
    %101 = vector.broadcast %c9_i32 : i32 to vector<48x1xi32>
    %102 = arith.cmpi eq, %9, %101 : vector<48x1xi32>
    %cst_33 = arith.constant -3.000000e+38 : f32
    %103 = vector.shape_cast %102 : vector<48x1xi1> to vector<48x1xi1>
    %104 = vector.broadcast %103 : vector<48x1xi1> to vector<48x128xi1>
    %105 = vector.broadcast %cst_33 : f32 to vector<48x128xf32>
    %106 = arith.select %104, %22, %105 : vector<48x128xi1>, vector<48x128xf32>
    %cst_34 = arith.constant dense<0xFF800000> : vector<128xf32>
    %107 = vector.multi_reduction <maximumf>, %106, %cst_34 [0] : vector<48x128xf32> to vector<128xf32>
    %108 = vector.shape_cast %107 : vector<128xf32> to vector<1x128xf32>
    %c10_i32 = arith.constant 10 : i32
    %109 = vector.broadcast %c10_i32 : i32 to vector<48x1xi32>
    %110 = arith.cmpi eq, %9, %109 : vector<48x1xi32>
    %cst_35 = arith.constant -3.000000e+38 : f32
    %111 = vector.shape_cast %110 : vector<48x1xi1> to vector<48x1xi1>
    %112 = vector.broadcast %111 : vector<48x1xi1> to vector<48x128xi1>
    %113 = vector.broadcast %cst_35 : f32 to vector<48x128xf32>
    %114 = arith.select %112, %22, %113 : vector<48x128xi1>, vector<48x128xf32>
    %cst_36 = arith.constant dense<0xFF800000> : vector<128xf32>
    %115 = vector.multi_reduction <maximumf>, %114, %cst_36 [0] : vector<48x128xf32> to vector<128xf32>
    %116 = vector.shape_cast %115 : vector<128xf32> to vector<1x128xf32>
    %c11_i32 = arith.constant 11 : i32
    %117 = vector.broadcast %c11_i32 : i32 to vector<48x1xi32>
    %118 = arith.cmpi eq, %9, %117 : vector<48x1xi32>
    %cst_37 = arith.constant -3.000000e+38 : f32
    %119 = vector.shape_cast %118 : vector<48x1xi1> to vector<48x1xi1>
    %120 = vector.broadcast %119 : vector<48x1xi1> to vector<48x128xi1>
    %121 = vector.broadcast %cst_37 : f32 to vector<48x128xf32>
    %122 = arith.select %120, %22, %121 : vector<48x128xi1>, vector<48x128xf32>
    %cst_38 = arith.constant dense<0xFF800000> : vector<128xf32>
    %123 = vector.multi_reduction <maximumf>, %122, %cst_38 [0] : vector<48x128xf32> to vector<128xf32>
    %124 = vector.shape_cast %123 : vector<128xf32> to vector<1x128xf32>
    %c12_i32 = arith.constant 12 : i32
    %125 = vector.broadcast %c12_i32 : i32 to vector<48x1xi32>
    %126 = arith.cmpi eq, %9, %125 : vector<48x1xi32>
    %cst_39 = arith.constant -3.000000e+38 : f32
    %127 = vector.shape_cast %126 : vector<48x1xi1> to vector<48x1xi1>
    %128 = vector.broadcast %127 : vector<48x1xi1> to vector<48x128xi1>
    %129 = vector.broadcast %cst_39 : f32 to vector<48x128xf32>
    %130 = arith.select %128, %22, %129 : vector<48x128xi1>, vector<48x128xf32>
    %cst_40 = arith.constant dense<0xFF800000> : vector<128xf32>
    %131 = vector.multi_reduction <maximumf>, %130, %cst_40 [0] : vector<48x128xf32> to vector<128xf32>
    %132 = vector.shape_cast %131 : vector<128xf32> to vector<1x128xf32>
    %c13_i32 = arith.constant 13 : i32
    %133 = vector.broadcast %c13_i32 : i32 to vector<48x1xi32>
    %134 = arith.cmpi eq, %9, %133 : vector<48x1xi32>
    %cst_41 = arith.constant -3.000000e+38 : f32
    %135 = vector.shape_cast %134 : vector<48x1xi1> to vector<48x1xi1>
    %136 = vector.broadcast %135 : vector<48x1xi1> to vector<48x128xi1>
    %137 = vector.broadcast %cst_41 : f32 to vector<48x128xf32>
    %138 = arith.select %136, %22, %137 : vector<48x128xi1>, vector<48x128xf32>
    %cst_42 = arith.constant dense<0xFF800000> : vector<128xf32>
    %139 = vector.multi_reduction <maximumf>, %138, %cst_42 [0] : vector<48x128xf32> to vector<128xf32>
    %140 = vector.shape_cast %139 : vector<128xf32> to vector<1x128xf32>
    %c14_i32 = arith.constant 14 : i32
    %141 = vector.broadcast %c14_i32 : i32 to vector<48x1xi32>
    %142 = arith.cmpi eq, %9, %141 : vector<48x1xi32>
    %cst_43 = arith.constant -3.000000e+38 : f32
    %143 = vector.shape_cast %142 : vector<48x1xi1> to vector<48x1xi1>
    %144 = vector.broadcast %143 : vector<48x1xi1> to vector<48x128xi1>
    %145 = vector.broadcast %cst_43 : f32 to vector<48x128xf32>
    %146 = arith.select %144, %22, %145 : vector<48x128xi1>, vector<48x128xf32>
    %cst_44 = arith.constant dense<0xFF800000> : vector<128xf32>
    %147 = vector.multi_reduction <maximumf>, %146, %cst_44 [0] : vector<48x128xf32> to vector<128xf32>
    %148 = vector.shape_cast %147 : vector<128xf32> to vector<1x128xf32>
    %c15_i32 = arith.constant 15 : i32
    %149 = vector.broadcast %c15_i32 : i32 to vector<48x1xi32>
    %150 = arith.cmpi eq, %9, %149 : vector<48x1xi32>
    %cst_45 = arith.constant -3.000000e+38 : f32
    %151 = vector.shape_cast %150 : vector<48x1xi1> to vector<48x1xi1>
    %152 = vector.broadcast %151 : vector<48x1xi1> to vector<48x128xi1>
    %153 = vector.broadcast %cst_45 : f32 to vector<48x128xf32>
    %154 = arith.select %152, %22, %153 : vector<48x128xi1>, vector<48x128xf32>
    %cst_46 = arith.constant dense<0xFF800000> : vector<128xf32>
    %155 = vector.multi_reduction <maximumf>, %154, %cst_46 [0] : vector<48x128xf32> to vector<128xf32>
    %156 = vector.shape_cast %155 : vector<128xf32> to vector<1x128xf32>
    %157 = tpu.concatenate %100, %108, %116, %124, %132, %140, %148, %156 in 0 : vector<1x128xf32>, vector<1x128xf32>, vector<1x128xf32>, vector<1x128xf32>, vector<1x128xf32>, vector<1x128xf32>, vector<1x128xf32>, vector<1x128xf32> -> vector<8x128xf32>
    %cst_47 = arith.constant -1.500000e+38 : f32
    %158 = vector.broadcast %cst_47 : f32 to vector<8x128xf32>
    %159 = arith.cmpf ogt, %157, %158 : vector<8x128xf32>
    %cst_48 = arith.constant 0.000000e+00 : f32
    %160 = vector.broadcast %cst_48 : f32 to vector<8x128xf32>
    %161 = arith.select %159, %157, %160 : vector<8x128xi1>, vector<8x128xf32>
    %c8 = arith.constant 8 : index
    %c0_49 = arith.constant 0 : index
    %162 = vector.load %arg5[%c8, %c0_49] : memref<16x128xf32, #tpu.memory_space<vmem>>, vector<8x128xf32>
    tpu.vector_store %arg5[%c8, %c0_49], %161 {strides = array<i32>} : memref<16x128xf32, #tpu.memory_space<vmem>>, vector<8x128xf32>,
    return
  }
}

</mosaic_0001>

<bundles_post_ra>
// kernel: tpu_custom_call.1
= control target key start
LH: loop header
LB: loop body
LE: loop exit
PB: predicated region body
PF: predicated region fallthrough
CT: control target
= control target key end

     0   :  { %10 = vsyncpa [#allocation3], 0  ;;  %s2122_s0 = inlined_call_operand.vmem [shape: f32[16,128], index: 0, kind: input, shape index: {}]   ;;  %s2123_s1 = inlined_call_operand.vmem [shape: s32[48,1], index: 1, kind: input, shape index: {}]   ;;  %s2124_s2 = inlined_call_operand.vmem [shape: s32[48,1], index: 2, kind: input, shape index: {}]   ;;  %s2125_s3 = inlined_call_operand.hbm [shape: f32[128,256], index: 3, kind: input, shape index: {}]   ;;  %s2126_s4 = inlined_call_operand.vmem [shape: f32[1,128], index: 4, kind: input, shape index: {}]   ;;  %s2127_s5 = inlined_call_operand.hbm [shape: f32[16,128], index: 5, kind: output, shape index: {}]  }
   0x1   :  { %11 = vsyncpa [#allocation4], 0  ;;  %s22_s20 = sshll.u32 %s2125_s3, 4  ;;  %s1218_s21 = smov [#allocation2]   ;;  %s23_s20 = int_to_ptr.hbm [resolvable:$true] %s22_s20 }
   0x2   :  { %s24_s22 = sshll.u32 %s1218_s21, 4  ;;  %s1219_s23 = smov 256   ;;  %s25_s22 = int_to_ptr.vmem [resolvable:$true] %s24_s22 }
   0x3   :  { %s1220_s24 = smov 16  }
   0x4   :  { %30 = dma.hbm_to_vmem [thread:$0]  %s23_s20, 4096, %s25_s22, [#allocation3], %s1219_s23, %s1219_s23, %s1220_s24  }
   0x5   :  { %1214 = dma.done.wait [#allocation3], 4096  }
   0x6   :  { %1215 = vsyncadd [#allocation3], 4294963200  ;;  %v1221_v0 = vmov 0   ;;  %v1265_v1 = vld [vmem:[%s2124_s2 + $0x20] sm:$0xff]  ;;  %v1270_v2 = vld [vmem:[%s2124_s2 + $0x10] sm:$0xff]  ;;  %s1125_s28 = sshll.u32 %s2127_s5, 4  ;;  %s1126_s28 = int_to_ptr.hbm [resolvable:$true] %s1125_s28 }
   0x7   :  { %1164 = vset.pattern.permute.xlu2 %v1221_v0  ;;  %1163 = vset.pattern.permute.xlu1 %v1221_v0  ;;  %v1275_v3 = vld [vmem:[%s2124_s2] sm:$0xff]  ;;  %v70_v4 = vld [vmem:[#allocation2 + $0xf8] sm:$0xff]  ;;  %v69_v5 = vld [vmem:[#allocation2 + $0xf0] sm:$0xff]  ;;  %vm246_vm0 = vcmp.eq.s32.totalorder %v1270_v2, 0  ;;  %vm248_vm4 = vcmp.eq.s32.totalorder %v1265_v1, 0  ;;  %vm299_vm6 = vcmp.eq.s32.totalorder %v1270_v2, 1 }
   0x8   :  { %1162 = vset.pattern.permute.xlu0 %v1221_v0  ;;  %150 = vperm.xlu2 %1164, %v1265_v1   ;;  %v68_v6 = vld [vmem:[#allocation2 + $0xe8] sm:$0xff]  ;;  %v67_v7 = vld [vmem:[#allocation2 + $0xe0] sm:$0xff]  ;;  %v66_v8 = vld [vmem:[#allocation2 + $0xd8] sm:$0xff]  ;;  %vm244_vm2 = vcmp.eq.s32.totalorder %v1275_v3, 0  ;;  %v252_v50 = vsel %vm246_vm0, 1, %v1221_v0  ;;  %v254_v57 = vsel %vm248_vm4, 1, %v1221_v0 }
   0x9   :  { %144 = vperm.xlu1 %1163, %v1270_v2   ;;  %138 = vperm.xlu0 %1162, %v1275_v3   ;;  %v65_v9 = vld [vmem:[#allocation2 + $0xd0] sm:$0xff]  ;;  %v64_v10 = vld [vmem:[#allocation2 + $0xc8] sm:$0xff]  ;;  %v1288_v12 = vld [vmem:[%s2124_s2 + $0x18] sm:$0xff]  ;;  %v250_v53 = vsel %vm244_vm2, 1, %v1221_v0  ;;  %vm297_vm8 = vcmp.eq.s32.totalorder %v1275_v3, 1  ;;  %v305_v59 = vsel %vm299_vm6, 1, %v1221_v0 }
   0xa   :  { %94 = vmatpush.msra.mxu1 %v70_v4  ;;  %71 = vmatpush.msra.mxu0 %v69_v5  ;;  %v1283_v11 = vld [vmem:[%s2124_s2 + $0x28] sm:$0xff]  ;;  %v63_v14 = vld [vmem:[#allocation2 + $0xc0] sm:$0xff]  ;;  %v62_v15 = vld [vmem:[#allocation2 + $0xb8] sm:$0xff]  ;;  %vm247_vm5 = vcmp.eq.s32.totalorder %v1288_v12, 0  ;;  %v303_v61 = vsel %vm297_vm8, 1, %v1221_v0  ;;  %vm301_vm10 = vcmp.eq.s32.totalorder %v1265_v1, 1 }
   0xb   :  { %v1293_v13 = vld [vmem:[%s2124_s2 + $0x8] sm:$0xff]  ;;  %v61_v16 = vld [vmem:[#allocation2 + $0xb0] sm:$0xff]  ;;  %v59_v19 = vld [vmem:[#allocation2 + $0xa0] sm:$0xff]  ;;  %vm249_vm3 = vcmp.eq.s32.totalorder %v1283_v11, 0  ;;  %v253_v58 = vsel %vm247_vm5, 1, %v1221_v0  ;;  %vm302_vm9 = vcmp.eq.s32.totalorder %v1283_v11, 1 }
   0xc   :  { %95 = vmatpush.msra.mxu1 %v68_v6  ;;  %72 = vmatpush.msra.mxu0 %v67_v7  ;;  %v60_v17 = vld [vmem:[#allocation2 + $0xa8] sm:$0xff]  ;;  %v125_v18 = vld [vmem:[%s2123_s1 + $0x10] sm:$0xff]  ;;  %v123_v21 = vld [vmem:[%s2123_s1] sm:$0xff]  ;;  %vm245_vm1 = vcmp.eq.s32.totalorder %v1293_v13, 0  ;;  %v255_v55 = vsel %vm249_vm3, 1, %v1221_v0  ;;  %vm298_vm7 = vcmp.eq.s32.totalorder %v1293_v13, 1 }
   0xd   :  { %v124_v20 = vld [vmem:[%s2123_s1 + $0x8] sm:$0xff]  ;;  %v58_v22 = vld [vmem:[#allocation2 + $0x98] sm:$0xff]  ;;  %v57_v23 = vld [vmem:[#allocation2 + $0x90] sm:$0xff]  ;;  %v163_v24 = vadd.s32 16, %v125_v18  ;;  %v161_v27 = vadd.s32 16, %v123_v21  ;;  %v251_v52 = vsel %vm245_vm1, 1, %v1221_v0 }
   0xe   :  { %96 = vmatpush.msra.mxu1 %v66_v8  ;;  %73 = vmatpush.msra.mxu0 %v65_v9  ;;  %v56_v25 = vld [vmem:[#allocation2 + $0x88] sm:$0xff]  ;;  %v162_v26 = vadd.s32 16, %v124_v20  ;;  %v55_v28 = vld [vmem:[#allocation2 + $0x80] sm:$0xff]  ;;  %v54_v29 = vld [vmem:[#allocation2 + $0x78] sm:$0xff]  ;;  %v304_v60 = vsel %vm298_vm7, 1, %v1221_v0  ;;  %vm300_vm11 = vcmp.eq.s32.totalorder %v1288_v12, 1 }
   0xf   :  { %v53_v30 = vld [vmem:[#allocation2 + $0x70] sm:$0xff]  ;;  %v52_v31 = vld [vmem:[#allocation2 + $0x68] sm:$0xff]  ;;  %v127_v33 = vld [vmem:[%s2123_s1 + $0x20] sm:$0xff]  ;;  %v308_v62 = vsel %vm302_vm9, 1, %v1221_v0  ;;  %v307_v63 = vsel %vm301_vm10, 1, %v1221_v0  ;;  %v306_v4 = vsel %vm300_vm11, 1, %v1221_v0 }
  0x10   :  { %97 = vmatpush.msra.mxu1 %v64_v10  ;;  %153 = vperm.xlu2 %1164, %v1283_v11   ;;  %v128_v32 = vld [vmem:[%s2123_s1 + $0x28] sm:$0xff]  ;;  %v51_v34 = vld [vmem:[#allocation2 + $0x60] sm:$0xff]  ;;  %v50_v35 = vld [vmem:[#allocation2 + $0x58] sm:$0xff]  ;;  %v165_v40 = vadd.s32 16, %v127_v33  ;;  %vm352_vm12 = vcmp.eq.s32.totalorder %v1270_v2, 2  ;;  %vm351_vm13 = vcmp.eq.s32.totalorder %v1293_v13, 2 }
  0x11   :  { %147 = vperm.xlu1 %1163, %v1288_v12   ;;  %141 = vperm.xlu0 %1162, %v1293_v13   ;;  %v126_v36 = vld [vmem:[%s2123_s1 + $0x18] sm:$0xff]  ;;  %v49_v37 = vld [vmem:[#allocation2 + $0x50] sm:$0xff]  ;;  %v48_v38 = vld [vmem:[#allocation2 + $0x48] sm:$0xff]  ;;  %v166_v39 = vadd.s32 16, %v128_v32  ;;  %vm350_vm14 = vcmp.eq.s32.totalorder %v1275_v3, 2  ;;  %v358_v5 = vsel %vm352_vm12, 1, %v1221_v0 }
  0x12   :  { %74 = vmatpush.msra.mxu0 %v63_v14  ;;  %98 = vmatpush.msra.mxu1 %v62_v15  ;;  %v164_v41 = vadd.s32 16, %v126_v36  ;;  %v47_v42 = vld [vmem:[#allocation2 + $0x40] sm:$0xff]  ;;  %v46_v43 = vld [vmem:[#allocation2 + $0x38] sm:$0xff]  ;;  %v45_v44 = vld [vmem:[#allocation2 + $0x30] sm:$0xff]  ;;  %v357_v6 = vsel %vm351_vm13, 1, %v1221_v0  ;;  %v356_v7 = vsel %vm350_vm14, 1, %v1221_v0 }
  0x13   :  { %v44_v45 = vld [vmem:[#allocation2 + $0x28] sm:$0xff]  ;;  %v43_v46 = vld [vmem:[#allocation2 + $0x20] sm:$0xff]  ;;  %v42_v47 = vld [vmem:[#allocation2 + $0x18] sm:$0xff]  ;;  %vm355_vm15 = vcmp.eq.s32.totalorder %v1283_v11, 2  ;;  %vm354_vm0 = vcmp.eq.s32.totalorder %v1265_v1, 2  ;;  %vm353_vm1 = vcmp.eq.s32.totalorder %v1288_v12, 2 }
  0x14   :  { %75 = vmatpush.msra.mxu0 %v61_v16  ;;  %99 = vmatpush.msra.mxu1 %v60_v17  ;;  %v41_v48 = vld [vmem:[#allocation2 + $0x10] sm:$0xff]  ;;  %v40_v49 = vld [vmem:[#allocation2 + $0x8] sm:$0xff]  ;;  %v37_v51 = vld [vmem:[%s2122_s0] sm:$0xff]  ;;  %v361_v8 = vsel %vm355_vm15, 1, %v1221_v0  ;;  %v360_v9 = vsel %vm354_vm0, 1, %v1221_v0  ;;  %v359_v10 = vsel %vm353_vm1, 1, %v1221_v0 }
  0x15   :  { %v39_v54 = vld [vmem:[#allocation2] sm:$0xff]  ;;  %v38_v56 = vld [vmem:[%s2122_s0 + $0x8] sm:$0xff]  ;;  %vm405_vm2 = vcmp.eq.s32.totalorder %v1270_v2, 3  ;;  %vm404_vm3 = vcmp.eq.s32.totalorder %v1293_v13, 3  ;;  %vm403_vm4 = vcmp.eq.s32.totalorder %v1275_v3, 3  ;;  %vm408_vm5 = vcmp.eq.s32.totalorder %v1283_v11, 3 }
  0x16   :  { %76 = vmatpush.msra.mxu0 %v59_v19  ;;  %100 = vmatpush.msra.mxu1 %v58_v22  ;;  %v411_v14 = vsel %vm405_vm2, 1, %v1221_v0  ;;  %v410_v15 = vsel %vm404_vm3, 1, %v1221_v0  ;;  %v409_v16 = vsel %vm403_vm4, 1, %v1221_v0  ;;  %vm407_vm6 = vcmp.eq.s32.totalorder %v1265_v1, 3  ;;  %s1224_s29 = smov 128   ;;  %s1225_s30 = smov 8  }
  0x17   :  { %vm406_vm7 = vcmp.eq.s32.totalorder %v1288_v12, 3  ;;  %v414_v17 = vsel %vm408_vm5, 1, %v1221_v0  ;;  %v413_v18 = vsel %vm407_vm6, 1, %v1221_v0  ;;  %vm458_vm8 = vcmp.eq.s32.totalorder %v1270_v2, 4 }
  0x18   :  { %77 = vmatpush.msra.mxu0 %v57_v23  ;;  %101 = vmatpush.msra.mxu1 %v56_v25  ;;  %v412_v19 = vsel %vm406_vm7, 1, %v1221_v0  ;;  %vm457_vm9 = vcmp.eq.s32.totalorder %v1293_v13, 4  ;;  %vm456_vm10 = vcmp.eq.s32.totalorder %v1275_v3, 4  ;;  %v464_v21 = vsel %vm458_vm8, 1, %v1221_v0 }
  0x19   :  { %174 = vperm.xlu2 %1164, %v163_v24   ;;  %171 = vperm.xlu1 %1163, %v162_v26   ;;  %v463_v22 = vsel %vm457_vm9, 1, %v1221_v0  ;;  %v462_v23 = vsel %vm456_vm10, 1, %v1221_v0  ;;  %vm461_vm11 = vcmp.eq.s32.totalorder %v1283_v11, 4  ;;  %vm460_vm12 = vcmp.eq.s32.totalorder %v1265_v1, 4 }
  0x1a   :  { %168 = vperm.xlu0 %1162, %v161_v27   ;;  %78 = vmatpush.msra.mxu0 %v55_v28  ;;  %vm459_vm13 = vcmp.eq.s32.totalorder %v1288_v12, 4  ;;  %v467_v25 = vsel %vm461_vm11, 1, %v1221_v0  ;;  %v466_v26 = vsel %vm460_vm12, 1, %v1221_v0  ;;  %vm511_vm14 = vcmp.eq.s32.totalorder %v1270_v2, 5 }
  0x1b   :  { %102 = vmatpush.msra.mxu1 %v54_v29  ;;  %v465_v27 = vsel %vm459_vm13, 1, %v1221_v0  ;;  %vm510_vm15 = vcmp.eq.s32.totalorder %v1293_v13, 5  ;;  %vm509_vm0 = vcmp.eq.s32.totalorder %v1275_v3, 5  ;;  %v517_v29 = vsel %vm511_vm14, 1, %v1221_v0 }
  0x1c   :  { %79 = vmatpush.msra.mxu0 %v53_v30  ;;  %v516_v30 = vsel %vm510_vm15, 1, %v1221_v0  ;;  %vm514_vm1 = vcmp.eq.s32.totalorder %v1283_v11, 5  ;;  %vm513_vm2 = vcmp.eq.s32.totalorder %v1265_v1, 5  ;;  %vm512_vm3 = vcmp.eq.s32.totalorder %v1288_v12, 5 }
  0x1d   :  { %103 = vmatpush.msra.mxu1 %v52_v31  ;;  %v515_v31 = vsel %vm509_vm0, 1, %v1221_v0  ;;  %v519_v36 = vsel %vm513_vm2, 1, %v1221_v0  ;;  %vm564_vm4 = vcmp.eq.s32.totalorder %v1270_v2, 6  ;;  %vm563_vm5 = vcmp.eq.s32.totalorder %v1293_v13, 6 }
  0x1e   :  { %80 = vmatpush.msra.mxu0 %v51_v34  ;;  %vm562_vm6 = vcmp.eq.s32.totalorder %v1275_v3, 6  ;;  %vm567_vm7 = vcmp.eq.s32.totalorder %v1283_v11, 6  ;;  %vm566_vm8 = vcmp.eq.s32.totalorder %v1265_v1, 6  ;;  %vm565_vm9 = vcmp.eq.s32.totalorder %v1288_v12, 6 }
  0x1f   :  { %104 = vmatpush.msra.mxu1 %v50_v35  ;;  %v520_v35 = vsel %vm514_vm1, 1, %v1221_v0  ;;  %vm617_vm10 = vcmp.eq.s32.totalorder %v1270_v2, 7  ;;  %vm616_vm11 = vcmp.eq.s32.totalorder %v1293_v13, 7  ;;  %vm615_vm12 = vcmp.eq.s32.totalorder %v1275_v3, 7 }
  0x20   :  { %81 = vmatpush.msra.mxu0 %v49_v37  ;;  %v518_v37 = vsel %vm512_vm3, 1, %v1221_v0  ;;  %vm620_vm13 = vcmp.eq.s32.totalorder %v1283_v11, 7  ;;  %vm619_vm14 = vcmp.eq.s32.totalorder %v1265_v1, 7  ;;  %vm618_vm15 = vcmp.eq.s32.totalorder %v1288_v12, 7 }
  0x21   :  { %105 = vmatpush.msra.mxu1 %v48_v38  ;;  %183 = vperm.xlu2 %1164, %v166_v39   ;;  %vm687_vm0 = vcmp.eq.s32.totalorder %v1270_v2, 8  ;;  %vm686_vm1 = vcmp.eq.s32.totalorder %v1293_v13, 8  ;;  %vm685_vm2 = vcmp.eq.s32.totalorder %v1275_v3, 8  ;;  %vm690_vm3 = vcmp.eq.s32.totalorder %v1283_v11, 8 }
  0x22   :  { %180 = vperm.xlu1 %1163, %v165_v40   ;;  %177 = vperm.xlu0 %1162, %v164_v41   ;;  %v570_v41 = vsel %vm564_vm4, 1, %v1221_v0  ;;  %vm689_vm4 = vcmp.eq.s32.totalorder %v1265_v1, 8 }
  0x23   :  { %82 = vmatpush.msra.mxu0 %v47_v42  ;;  %106 = vmatpush.msra.mxu1 %v46_v43  ;;  %v569_v42 = vsel %vm563_vm5, 1, %v1221_v0  ;;  %v568_v43 = vsel %vm562_vm6, 1, %v1221_v0  ;;  %vm688_vm5 = vcmp.eq.s32.totalorder %v1288_v12, 8 }
  0x25   :  { %83 = vmatpush.msra.mxu0 %v45_v44  ;;  %107 = vmatpush.msra.mxu1 %v44_v45 }
  0x27   :  { %84 = vmatpush.msra.mxu0 %v43_v46  ;;  %108 = vmatpush.msra.mxu1 %v42_v47  ;;  %v573_v47 = vsel %vm567_vm7, 1, %v1221_v0 }
  0x29   :  { %85 = vmatpush.msra.mxu0 %v41_v48  ;;  %109 = vmatpush.msra.mxu1 %v40_v49  ;;  %v572_v48 = vsel %vm566_vm8, 1, %v1221_v0  ;;  %v571_v49 = vsel %vm565_vm9, 1, %v1221_v0  ;;  %vm740_vm8 = vcmp.eq.s32.totalorder %v1270_v2, 9 }
  0x2a   :  { %263 = vperm.xlu2 %1164, %v252_v50   ;;  %110 = vmatmul.f32.vlgmr.msra.gmra.mxu1 %v37_v51 }
  0x2b   :  { %260 = vperm.xlu1 %1163, %v251_v52   ;;  %257 = vperm.xlu0 %1162, %v250_v53   ;;  %v623_v53 = vsel %vm617_vm10, 1, %v1221_v0 }
  0x2c   :  { %86 = vmatpush.msra.mxu0 %v39_v54  ;;  %v622_v54 = vsel %vm616_vm11, 1, %v1221_v0 }
  0x2d   :  { %87 = vmatmul.f32.vlgmr.msra.gmra.mxu0 %v37_v51 }
  0x32   :  { %272 = vperm.xlu2 %1164, %v255_v55   ;;  %113 = vmatmul.f32.gmra.mxu1 %v38_v56  ;;  %v621_v55 = vsel %vm615_vm12, 1, %v1221_v0  ;;  %vm739_vm12 = vcmp.eq.s32.totalorder %v1293_v13, 9 }
  0x33   :  { %269 = vperm.xlu1 %1163, %v254_v57   ;;  %266 = vperm.xlu0 %1162, %v253_v58  }
  0x35   :  { %90 = vmatmul.f32.gmra.mxu0 %v38_v56 }
  0x3a   :  { %316 = vperm.xlu2 %1164, %v305_v59   ;;  %v626_v59 = vsel %vm620_vm13, 1, %v1221_v0  ;;  %vm738_vm13 = vcmp.eq.s32.totalorder %v1275_v3, 9 }
  0x3b   :  { %313 = vperm.xlu1 %1163, %v304_v60   ;;  %310 = vperm.xlu0 %1162, %v303_v61   ;;  %v625_v60 = vsel %vm619_vm14, 1, %v1221_v0  ;;  %v624_v61 = vsel %vm618_vm15, 1, %v1221_v0 }
  0x42   :  { %325 = vperm.xlu2 %1164, %v308_v62  }
  0x43   :  { %322 = vperm.xlu1 %1163, %v307_v63   ;;  %319 = vperm.xlu0 %1162, %v306_v4  }
  0x4a   :  { %369 = vperm.xlu2 %1164, %v358_v5   ;;  %v693_v5 = vsel %vm687_vm0, 1, %v1221_v0 }
  0x4b   :  { %366 = vperm.xlu1 %1163, %v357_v6   ;;  %363 = vperm.xlu0 %1162, %v356_v7   ;;  %v692_v7 = vsel %vm686_vm1, 1, %v1221_v0 }
  0x52   :  { %378 = vperm.xlu2 %1164, %v361_v8   ;;  %v691_v8 = vsel %vm685_vm2, 1, %v1221_v0  ;;  %vm743_vm2 = vcmp.eq.s32.totalorder %v1283_v11, 9 }
  0x53   :  { %375 = vperm.xlu1 %1163, %v360_v9   ;;  %372 = vperm.xlu0 %1162, %v359_v10  }
  0x5a   :  { %422 = vperm.xlu2 %1164, %v411_v14   ;;  %v135_v14 = vlaneseq }
  0x5b   :  { %419 = vperm.xlu1 %1163, %v410_v15   ;;  %416 = vperm.xlu0 %1162, %v409_v16  }
  0x62   :  { %431 = vperm.xlu2 %1164, %v414_v17   ;;  %v1370_v20 = vpop.permute.xlu2 %150  ;;  %v1165_v17 = vld [vmem:[%s2126_s4] ss:$0 sm:$0xff]  ;;  %s1223_s4 = smov [#allocation5]  }
  0x63   :  { %428 = vperm.xlu1 %1163, %v413_v18   ;;  %425 = vperm.xlu0 %1162, %v412_v19   ;;  %v696_v18 = vsel %vm690_vm3, 1, %v1221_v0  ;;  %s1123_s26 = sshll.u32 %s1223_s4, 4  ;;  %s1124_s26 = int_to_ptr.vmem [resolvable:$true] %s1123_s26 }
  0x6a   :  { %475 = vperm.xlu2 %1164, %v464_v21   ;;  %v1378_v24 = vpop.permute.xlu2 %153  ;;  %v1479_v21 = vand.u32 127, %v135_v14 }
  0x6b   :  { %472 = vperm.xlu1 %1163, %v463_v22   ;;  %469 = vperm.xlu0 %1162, %v462_v23   ;;  %v695_v22 = vsel %vm689_vm4, 1, %v1221_v0  ;;  %v694_v23 = vsel %vm688_vm5, 1, %v1221_v0  ;;  %vm742_vm5 = vcmp.eq.s32.totalorder %v1265_v1, 9 }
  0x6c   :  { %vm159_vm10 = vcmp.eq.s32.totalorder %v1479_v21, %v1370_v20  ;;  %v745_v20 = vsel %vm739_vm12, 1, %v1221_v0  ;;  %vm160_vm15 = vcmp.eq.s32.totalorder %v1479_v21, %v1378_v24  ;;  %v749_v24 = vsel %vm743_vm2, 1, %v1221_v0 }
  0x6d   :  { %vm791_vm12 = vcmp.eq.s32.totalorder %v1275_v3, 10  ;;  %vm794_vm2 = vcmp.eq.s32.totalorder %v1288_v12, 10 }
  0x72   :  { %484 = vperm.xlu2 %1164, %v467_v25  }
  0x73   :  { %481 = vperm.xlu1 %1163, %v466_v26   ;;  %v1386_v28 = vpop.permute.xlu2 %174  ;;  %478 = vperm.xlu0 %1162, %v465_v27  }
  0x7a   :  { %528 = vperm.xlu2 %1164, %v517_v29  }
  0x7b   :  { %525 = vperm.xlu1 %1163, %v516_v30   ;;  %v1394_v32 = vpop.permute.xlu1 %144  ;;  %522 = vperm.xlu0 %1162, %v515_v31   ;;  %v1396_v33 = vpop.permute.xlu0 %138 }
  0x7c   :  { %v1398_v34 = vpop.permute.xlu2 %183  ;;  %vm155_vm9 = vcmp.eq.s32.totalorder %v1479_v21, %v1396_v33  ;;  %v746_v33 = vsel %vm740_vm8, 1, %v1221_v0  ;;  %vm187_vm8 = vcmp.eq.s32.totalorder %v1479_v21, %v1386_v28 }
  0x7d   :  { %vm190_vm0 = vcmp.eq.s32.totalorder %v1479_v21, %v1398_v34  ;;  %v748_v34 = vsel %vm742_vm5, 1, %v1221_v0  ;;  %vm845_vm5 = vcmp.eq.s32.totalorder %v1293_v13, 11 }
  0x7e   :  { %vm196_vm3 = vmor %vm160_vm15, %vm190_vm0  ;;  %vm796_vm15 = vcmp.eq.s32.totalorder %v1283_v11, 10 }
  0x82   :  { %537 = vperm.xlu2 %1164, %v520_v35   ;;  %v1222_v35 = vmov 1.0  }
  0x83   :  { %534 = vperm.xlu1 %1163, %v519_v36   ;;  %v1406_v38 = vpop.permute.xlu1 %147  ;;  %531 = vperm.xlu0 %1162, %v518_v37   ;;  %v1408_v39 = vpop.permute.xlu0 %141  ;;  %v744_v36 = vsel %vm738_vm13, 1, %v1221_v0 }
  0x84   :  { %v1410_v40 = vpop.permute.xlu2 %263  ;;  %vm156_vm4 = vcmp.eq.s32.totalorder %v1479_v21, %v1408_v39  ;;  %vm158_vm0 = vcmp.eq.s32.totalorder %v1479_v21, %v1406_v38 }
  0x8a   :  { %581 = vperm.xlu2 %1164, %v570_v41  }
  0x8b   :  { %578 = vperm.xlu1 %1163, %v569_v42   ;;  %575 = vperm.xlu0 %1162, %v568_v43   ;;  %v1420_v45 = vpop.permute.xlu1 %171 }
  0x8c   :  { %v1418_v44 = vpop.permute.xlu2 %272  ;;  %v1423_v46 = vpop.permute.xlu0 %168  ;;  %vm186_vm1 = vcmp.eq.s32.totalorder %v1479_v21, %v1420_v45 }
  0x8d   :  { %vm185_vm6 = vcmp.eq.s32.totalorder %v1479_v21, %v1423_v46 }
  0x8e   :  { %vm191_vm11 = vmor %vm155_vm9, %vm185_vm6  ;;  %vm741_vm6 = vcmp.eq.s32.totalorder %v1288_v12, 9  ;;  %vm157_vm9 = vcmp.eq.s32.totalorder %v1479_v21, %v1394_v32 }
  0x8f   :  { %v747_v43 = vsel %vm741_vm6, 1, %v1221_v0  ;;  %vm193_vm13 = vmor %vm157_vm9, %vm187_vm8  ;;  %vm844_vm6 = vcmp.eq.s32.totalorder %v1275_v3, 11  ;;  %vm848_vm8 = vcmp.eq.s32.totalorder %v1265_v1, 11  ;;  %vm847_vm9 = vcmp.eq.s32.totalorder %v1288_v12, 11 }
  0x90   :  { %v854_v14 = vsel %vm848_vm8, 1, %v1221_v0  ;;  %vm1003_vm8 = vcmp.eq.s32.totalorder %v1275_v3, 14 }
  0x92   :  { %590 = vperm.xlu2 %1164, %v573_v47   ;;  %v797_v47 = vsel %vm791_vm12, 1, %v1221_v0  ;;  %vm897_vm12 = vcmp.eq.s32.totalorder %v1275_v3, 12 }
  0x93   :  { %587 = vperm.xlu1 %1163, %v572_v48   ;;  %584 = vperm.xlu0 %1162, %v571_v49  }
  0x94   :  { %v1430_v50 = vpop.permute.xlu2 %316  ;;  %v1432_v51 = vpop.permute.xlu1 %180 }
  0x95   :  { %v1435_v52 = vpop.permute.xlu0 %177  ;;  %vm189_vm7 = vcmp.eq.s32.totalorder %v1479_v21, %v1432_v51 }
  0x96   :  { %vm195_vm14 = vmor %vm159_vm10, %vm189_vm7  ;;  %vm793_vm10 = vcmp.eq.s32.totalorder %v1270_v2, 10 }
  0x97   :  { %vm192_vm7 = vmor %vm156_vm4, %vm186_vm1  ;;  %v799_v28 = vsel %vm793_vm10, 1, %v1221_v0  ;;  %vm795_vm1 = vcmp.eq.s32.totalorder %v1265_v1, 10  ;;  %vm846_vm4 = vcmp.eq.s32.totalorder %v1270_v2, 11  ;;  %vm899_vm10 = vcmp.eq.s32.totalorder %v1270_v2, 12 }
  0x9a   :  { %634 = vperm.xlu2 %1164, %v623_v53   ;;  %v801_v53 = vsel %vm795_vm1, 1, %v1221_v0  ;;  %vm951_vm1 = vcmp.eq.s32.totalorder %v1293_v13, 13 }
  0x9b   :  { %631 = vperm.xlu1 %1163, %v622_v54   ;;  %628 = vperm.xlu0 %1162, %v621_v55   ;;  %v800_v54 = vsel %vm794_vm2, 1, %v1221_v0  ;;  %vm950_vm2 = vcmp.eq.s32.totalorder %v1275_v3, 13 }
  0x9c   :  { %v1442_v56 = vpop.permute.xlu2 %325 }
  0x9d   :  { %v1445_v57 = vpop.permute.xlu1 %260  ;;  %v1448_v58 = vpop.permute.xlu0 %257 }
  0xa2   :  { %643 = vperm.xlu2 %1164, %v626_v59  }
  0xa3   :  { %640 = vperm.xlu1 %1163, %v625_v60   ;;  %637 = vperm.xlu0 %1162, %v624_v61   ;;  %v852_v60 = vsel %vm846_vm4, 1, %v1221_v0  ;;  %v851_v61 = vsel %vm845_vm5, 1, %v1221_v0  ;;  %vm954_vm4 = vcmp.eq.s32.totalorder %v1265_v1, 13  ;;  %vm953_vm5 = vcmp.eq.s32.totalorder %v1288_v12, 13 }
  0xa4   :  { %v1454_v62 = vpop.permute.xlu2 %369 }
  0xa5   :  { %v1457_v63 = vpop.permute.xlu1 %269  ;;  %v1460_v4 = vpop.permute.xlu0 %266 }
  0xa7   :  { %v111_v6 = vpop.f32.mrf.mxu1 }
  0xaa   :  { %v88_v9 = vpop.f32.mrf.mxu0  ;;  %704 = vperm.xlu2 %1164, %v693_v5   ;;  %v850_v5 = vsel %vm844_vm6, 1, %v1221_v0  ;;  %vm1007_vm6 = vcmp.eq.s32.totalorder %v1265_v1, 14 }
  0xab   :  { %701 = vperm.xlu1 %1163, %v692_v7   ;;  %698 = vperm.xlu0 %1162, %v691_v8   ;;  %v121_v26 = vadd.f32 %v1165_v17, %v88_v9 }
  0xac   :  { %v1466_v10 = vpop.permute.xlu2 %378 }
  0xad   :  { %v1469_v15 = vpop.permute.xlu1 %313  ;;  %v1471_v16 = vpop.permute.xlu0 %310 }
  0xaf   :  { %v114_v19 = vpop.f32.mrf.mxu1 }
  0xb0   :  { %221 = vmatpush.msra.mxu2 %v114_v19  ;;  %1150 = vmatpush.msra.mxu3 %v114_v19 }
  0xb2   :  { %v91_v25 = vpop.f32.mrf.mxu0  ;;  %713 = vperm.xlu2 %1164, %v696_v18   ;;  %222 = vmatpush.msra.mxu2 %v111_v6 }
  0xb3   :  { %v122_v27 = vadd.f32 %v1165_v17, %v91_v25  ;;  %1151 = vmatpush.msra.mxu3 %v111_v6  ;;  %710 = vperm.xlu1 %1163, %v695_v22   ;;  %v853_v17 = vsel %vm847_vm9, 1, %v1221_v0  ;;  %v905_v22 = vsel %vm899_vm10, 1, %v1221_v0  ;;  %v903_v25 = vsel %vm897_vm12, 1, %v1221_v0 }
  0xb4   :  { %707 = vperm.xlu0 %1162, %v694_v23   ;;  %v1487_v29 = vpop.permute.xlu2 %422  ;;  %vm1057_vm9 = vcmp.eq.s32.totalorder %v1293_v13, 15  ;;  %vm1056_vm10 = vcmp.eq.s32.totalorder %v1275_v3, 15  ;;  %vm1005_vm12 = vcmp.eq.s32.totalorder %v1270_v2, 14 }
  0xb5   :  { %223 = vmatpush.msra.mxu2 %v122_v27  ;;  %1152 = vmatpush.msra.mxu3 %v122_v27  ;;  %v1492_v30 = vpop.permute.xlu1 %322  ;;  %v1499_v31 = vpop.permute.xlu0 %319  ;;  %v1011_v3 = vsel %vm1005_vm12, 1, %v1221_v0 }
  0xb7   :  { %224 = vmatpush.msra.mxu2 %v121_v26  ;;  %1153 = vmatpush.msra.mxu3 %v121_v26 }
  0xb8   :  { %1144 = vmatmul.msk.f32.vlgmr.msra.gmra.mxu2 %vm191_vm11, %v1222_v35  ;;  %1148 = vmatmul.msk.f32.vlgmr.msra.gmra.mxu3 %vm195_vm14, %v1222_v35  ;;  %vm792_vm11 = vcmp.eq.s32.totalorder %v1293_v13, 10  ;;  %vm188_vm14 = vcmp.eq.s32.totalorder %v1479_v21, %v1435_v52  ;;  %v802_v52 = vsel %vm796_vm15, 1, %v1221_v0  ;;  %vm900_vm15 = vcmp.eq.s32.totalorder %v1288_v12, 12 }
  0xb9   :  { %v798_v32 = vsel %vm792_vm11, 1, %v1221_v0  ;;  %vm898_vm11 = vcmp.eq.s32.totalorder %v1293_v13, 12 }
  0xba   :  { %757 = vperm.xlu2 %1164, %v746_v33   ;;  %v904_v23 = vsel %vm898_vm11, 1, %v1221_v0  ;;  %vm1008_vm11 = vcmp.eq.s32.totalorder %v1283_v11, 14 }
  0xbb   :  { %754 = vperm.xlu1 %1163, %v745_v20  }
  0xbc   :  { %751 = vperm.xlu0 %1162, %v744_v36   ;;  %v1512_v37 = vpop.permute.xlu2 %431  ;;  %v906_v36 = vsel %vm900_vm15, 1, %v1221_v0  ;;  %vm1059_vm15 = vcmp.eq.s32.totalorder %v1288_v12, 15 }
  0xbd   :  { %v1515_v41 = vpop.permute.xlu1 %366  ;;  %v1519_v42 = vpop.permute.xlu0 %363 }
  0xc0   :  { %1145 = vmatmul.msk.f32.gmra.mxu2 %vm192_vm7, %v1222_v35  ;;  %1149 = vmatmul.msk.f32.gmra.mxu3 %vm196_vm3, %v1222_v35  ;;  %vm194_vm3 = vmor %vm158_vm0, %vm188_vm14  ;;  %vm849_vm7 = vcmp.eq.s32.totalorder %v1283_v11, 11  ;;  %vm901_vm14 = vcmp.eq.s32.totalorder %v1265_v1, 12  ;;  %vm952_vm0 = vcmp.eq.s32.totalorder %v1270_v2, 13 }
  0xc1   :  { %v855_v9 = vsel %vm849_vm7, 1, %v1221_v0  ;;  %v907_v20 = vsel %vm901_vm14, 1, %v1221_v0  ;;  %vm1004_vm7 = vcmp.eq.s32.totalorder %v1293_v13, 14  ;;  %vm1060_vm14 = vcmp.eq.s32.totalorder %v1265_v1, 15 }
  0xc2   :  { %766 = vperm.xlu2 %1164, %v749_v24   ;;  %v1065_v1 = vsel %vm1059_vm15, 1, %v1221_v0  ;;  %vm332_vm15 = vcmp.eq.s32.totalorder %v1442_v56, 1 }
  0xc3   :  { %763 = vperm.xlu1 %1163, %v748_v34  }
  0xc4   :  { %760 = vperm.xlu0 %1162, %v747_v43   ;;  %v1530_v39 = vpop.permute.xlu2 %475 }
  0xc5   :  { %v1533_v45 = vpop.permute.xlu1 %375  ;;  %v1535_v46 = vpop.permute.xlu0 %372 }
  0xc8   :  { %1146 = vmatmul.msk.f32.gmra.mxu2 %vm193_vm13, %v1222_v35  ;;  %vm902_vm13 = vcmp.eq.s32.totalorder %v1283_v11, 12 }
  0xca   :  { %810 = vperm.xlu2 %1164, %v799_v28   ;;  %v958_v28 = vsel %vm952_vm0, 1, %v1221_v0  ;;  %vm1058_vm0 = vcmp.eq.s32.totalorder %v1270_v2, 15 }
  0xcb   :  { %807 = vperm.xlu1 %1163, %v798_v32   ;;  %v957_v32 = vsel %vm951_vm1, 1, %v1221_v0  ;;  %vm1006_vm1 = vcmp.eq.s32.totalorder %v1288_v12, 14 }
  0xcc   :  { %804 = vperm.xlu0 %1162, %v797_v47   ;;  %v1544_v48 = vpop.permute.xlu2 %484  ;;  %v956_v47 = vsel %vm950_vm2, 1, %v1221_v0  ;;  %vm274_vm2 = vcmp.eq.s32.totalorder %v1448_v58, 1 }
  0xcd   :  { %v1547_v49 = vpop.permute.xlu1 %419  ;;  %v1551_v51 = vpop.permute.xlu0 %416 }
  0xd0   :  { %1147 = vmatmul.msk.f32.gmra.mxu2 %vm194_vm3, %v1222_v35  ;;  %v908_v35 = vsel %vm902_vm13, 1, %v1221_v0  ;;  %vm955_vm3 = vcmp.eq.s32.totalorder %v1283_v11, 13  ;;  %vm1061_vm13 = vcmp.eq.s32.totalorder %v1283_v11, 15  ;;  %v1064_v11 = vsel %vm1058_vm0, 1, %v1221_v0 }
  0xd2   :  { %819 = vperm.xlu2 %1164, %v802_v52  }
  0xd3   :  { %816 = vperm.xlu1 %1163, %v801_v53  }
  0xd4   :  { %813 = vperm.xlu0 %1162, %v800_v54   ;;  %v1558_v55 = vpop.permute.xlu2 %528 }
  0xd5   :  { %v1561_v38 = vpop.permute.xlu1 %428  ;;  %v1563_v59 = vpop.permute.xlu0 %425 }
  0xda   :  { %863 = vperm.xlu2 %1164, %v852_v60   ;;  %v961_v60 = vsel %vm955_vm3, 1, %v1221_v0  ;;  %vm278_vm3 = vcmp.eq.s32.totalorder %v1457_v63, 1 }
  0xdb   :  { %860 = vperm.xlu1 %1163, %v851_v61   ;;  %v960_v61 = vsel %vm954_vm4, 1, %v1221_v0  ;;  %vm327_vm4 = vcmp.eq.s32.totalorder %v1471_v16, 1 }
  0xdc   :  { %857 = vperm.xlu0 %1162, %v850_v5   ;;  %v1570_v6 = vpop.permute.xlu2 %537  ;;  %v959_v5 = vsel %vm953_vm5, 1, %v1221_v0  ;;  %vm331_vm5 = vcmp.eq.s32.totalorder %v1492_v30, 1 }
  0xdd   :  { %v1573_v7 = vpop.permute.xlu1 %472  ;;  %v1575_v8 = vpop.permute.xlu0 %469 }
  0xe2   :  { %872 = vperm.xlu2 %1164, %v855_v9  }
  0xe3   :  { %869 = vperm.xlu1 %1163, %v854_v14  }
  0xe4   :  { %866 = vperm.xlu0 %1162, %v853_v17   ;;  %v1582_v18 = vpop.permute.xlu2 %581 }
  0xe5   :  { %2128 = vst [vmem:[#allocation8_spill] sm:$0xff] %v1582_v18  ;;  %v1585_v19 = vpop.permute.xlu1 %481  ;;  %v1587_v21 = vpop.permute.xlu0 %478 }
  0xea   :  { %916 = vperm.xlu2 %1164, %v905_v22   ;;  %v1013_v22 = vsel %vm1007_vm6, 1, %v1221_v0  ;;  %vm380_vm6 = vcmp.eq.s32.totalorder %v1519_v42, 1 }
  0xeb   :  { %913 = vperm.xlu1 %1163, %v904_v23   ;;  %v1010_v23 = vsel %vm1004_vm7, 1, %v1221_v0  ;;  %vm384_vm7 = vcmp.eq.s32.totalorder %v1533_v45, 1 }
  0xec   :  { %910 = vperm.xlu0 %1162, %v903_v25   ;;  %v1594_v26 = vpop.permute.xlu2 %590  ;;  %v1009_v25 = vsel %vm1003_vm8, 1, %v1221_v0  ;;  %vm433_vm8 = vcmp.eq.s32.totalorder %v1551_v51, 1 }
  0xed   :  { %2129 = vst [vmem:[#allocation9_spill] sm:$0xff] %v1594_v26  ;;  %v1597_v27 = vpop.permute.xlu1 %525  ;;  %v1599_v33 = vpop.permute.xlu0 %522 }
  0xee   :  { %vm539_vm12 = vcmp.eq.s32.totalorder %v1599_v33, 1 }
  0xf2   :  { %925 = vperm.xlu2 %1164, %v908_v35  }
  0xf3   :  { %922 = vperm.xlu1 %1163, %v907_v20  }
  0xf4   :  { %919 = vperm.xlu0 %1162, %v906_v36   ;;  %v1606_v24 = vpop.permute.xlu2 %634 }
  0xf5   :  { %2130 = vst [vmem:[#allocation10_spill] sm:$0xff] %v1606_v24  ;;  %v1609_v34 = vpop.permute.xlu1 %534  ;;  %v1611_v43 = vpop.permute.xlu0 %531 }
  0xfa   :  { %969 = vperm.xlu2 %1164, %v958_v28   ;;  %v1063_v28 = vsel %vm1057_vm9, 1, %v1221_v0  ;;  %vm437_vm9 = vcmp.eq.s32.totalorder %v1561_v38, 1 }
  0xfb   :  { %966 = vperm.xlu1 %1163, %v957_v32   ;;  %v1062_v32 = vsel %vm1056_vm10, 1, %v1221_v0  ;;  %vm381_vm10 = vcmp.eq.s32.totalorder %v1515_v41, 1 }
  0xfc   :  { %963 = vperm.xlu0 %1162, %v956_v47   ;;  %v1618_v52 = vpop.permute.xlu2 %643  ;;  %v1014_v47 = vsel %vm1008_vm11, 1, %v1221_v0  ;;  %vm490_vm11 = vcmp.eq.s32.totalorder %v1585_v19, 1 }
  0xfd   :  { %2131 = vst [vmem:[#allocation11_spill] sm:$0xff] %v1618_v52  ;;  %v1621_v53 = vpop.permute.xlu1 %578  ;;  %v1623_v54 = vpop.permute.xlu0 %575 }
  0xfe   :  { %2132 = vst [vmem:[#allocation12_spill] sm:$0xff] %v1621_v53 }
 0x102   :  { %978 = vperm.xlu2 %1164, %v961_v60  }
 0x103   :  { %975 = vperm.xlu1 %1163, %v960_v61  }
 0x104   :  { %972 = vperm.xlu0 %1162, %v959_v5   ;;  %v1630_v9 = vpop.permute.xlu2 %704  ;;  %v1067_v5 = vsel %vm1061_vm13, 1, %v1221_v0  ;;  %vm543_vm13 = vcmp.eq.s32.totalorder %v1609_v34, 1 }
 0x105   :  { %v1633_v14 = vpop.permute.xlu1 %587  ;;  %v1635_v17 = vpop.permute.xlu0 %584 }
 0x106   :  { %2133 = vst [vmem:[#allocation13_spill] sm:$0xff] %v1635_v17 }
 0x10a   :  { %1028 = vperm.xlu2 %1164, %v1013_v22   ;;  %v1066_v22 = vsel %vm1060_vm14, 1, %v1221_v0 }
 0x10b   :  { %1019 = vperm.xlu1 %1163, %v1010_v23  }
 0x10c   :  { %1016 = vperm.xlu0 %1162, %v1009_v25   ;;  %v1642_v35 = vpop.permute.xlu2 %713 }
 0x10d   :  { %v1645_v20 = vpop.permute.xlu1 %631  ;;  %v1647_v36 = vpop.permute.xlu0 %628 }
 0x10e   :  { %2134 = vst [vmem:[#allocation14_spill] sm:$0xff] %v1645_v20 }
 0x10f   :  { %2135 = vst [vmem:[#allocation15_spill] sm:$0xff] %v1647_v36 }
 0x112   :  { %1072 = vperm.xlu2 %1164, %v1063_v28  }
 0x113   :  { %1069 = vperm.xlu1 %1163, %v1062_v32   ;;  %v1012_v32 = vsel %vm1006_vm1, 1, %v1221_v0  ;;  %vm328_vm1 = vcmp.eq.s32.totalorder %v1469_v15, 1 }
 0x114   :  { %1031 = vperm.xlu0 %1162, %v1014_v47   ;;  %v1654_v60 = vpop.permute.xlu2 %757 }
 0x115   :  { %v1657_v13 = vpop.permute.xlu1 %640  ;;  %v1659_v61 = vpop.permute.xlu0 %637 }
 0x116   :  { %2136 = vst [vmem:[#allocation16_spill] sm:$0xff] %v1657_v13 }
 0x117   :  { %2137 = vst [vmem:[#allocation17_spill] sm:$0xff] %v1659_v61 }
 0x11a   :  { %1022 = vperm.xlu2 %1164, %v1011_v3  }
 0x11b   :  { %1084 = vperm.xlu1 %1163, %v1067_v5  }
 0x11c   :  { %1081 = vperm.xlu0 %1162, %v1066_v22   ;;  %v1666_v23 = vpop.permute.xlu2 %766 }
 0x11d   :  { %v1669_v25 = vpop.permute.xlu1 %701  ;;  %v1671_v28 = vpop.permute.xlu0 %698 }
 0x11e   :  { %vm715_vm0 = vcmp.eq.s32.totalorder %v1671_v28, 1 }
 0x122   :  { %1078 = vperm.xlu2 %1164, %v1065_v1  }
 0x123   :  { %1075 = vperm.xlu1 %1163, %v1064_v11  }
 0x124   :  { %1025 = vperm.xlu0 %1162, %v1012_v32   ;;  %v1678_v47 = vpop.permute.xlu2 %810 }
 0x125   :  { %v711_v3 = vpop.permute.xlu1 %710 }
 0x126   :  { %v1680_v5 = vpop.permute.xlu0 %707  ;;  %vm719_vm14 = vcmp.eq.s32.totalorder %v711_v3, 1 }
 0x12c   :  { %v1682_v22 = vpop.permute.xlu2 %819 }
 0x12d   :  { %v1684_v24 = vpop.permute.xlu1 %754 }
 0x12e   :  { %v752_v2 = vpop.permute.xlu0 %751 }
 0x134   :  { %v1686_v12 = vpop.permute.xlu2 %863 }
 0x135   :  { %v764_v61 = vpop.permute.xlu1 %763 }
 0x136   :  { %v1688_v20 = vpop.permute.xlu0 %760 }
 0x13b   :  { %v1705_v0 = vpop.f32.mrf.mxu2  ;;  %v1707_v1 = vpop.f32.mrf.mxu3 }
 0x13c   :  { %v1714_v11 = vsel %vm274_vm2, %v1705_v0, -3e+38  ;;  %v1719_v32 = vsel %vm278_vm3, %v1707_v1, -3e+38  ;;  %v1724_v52 = vsel %vm327_vm4, %v1705_v0, -3e+38 }
 0x13d   :  { %v286_v58 = vmax.f32 %v1714_v11, %v1719_v32  ;;  %v1734_v63 = vsel %vm331_vm5, %v1707_v1, -3e+38  ;;  %v1739_v16 = vsel %vm380_vm6, %v1705_v0, -3e+38  ;;  %vm385_vm2 = vcmp.eq.s32.totalorder %v1466_v10, 1  ;;  %v808_v13 = vpop.permute.xlu1 %807 }
 0x13e   :  { %v805_v36 = vpop.permute.xlu0 %804  ;;  %v339_v17 = vmax.f32 %v1724_v52, %v1734_v63  ;;  %v1747_v11 = vsel %vm384_vm7, %v1707_v1, -3e+38  ;;  %v1752_v30 = vsel %vm433_vm8, %v1705_v0, -3e+38  ;;  %v1757_v42 = vsel %vm437_vm9, %v1707_v1, -3e+38  ;;  %v1761_v52 = vpop.permute.xlu2 %872 }
 0x13f   :  { %vm434_vm3 = vcmp.eq.s32.totalorder %v1547_v49, 1  ;;  %vm826_vm4 = vcmp.eq.s32.totalorder %v1682_v22, 1  ;;  %vm768_vm5 = vcmp.eq.s32.totalorder %v752_v2, 1  ;;  %v392_v45 = vmax.f32 %v1739_v16, %v1747_v11 }
 0x140   :  { %vm772_vm7 = vcmp.eq.s32.totalorder %v764_v61, 1  ;;  %vm822_vm8 = vcmp.eq.s32.totalorder %v808_v13, 1  ;;  %v1771_v38 = vsel %vm715_vm0, %v1705_v0, -3e+38  ;;  %v1775_v2 = vsel %vm719_vm14, %v1707_v1, -3e+38 }
 0x141   :  { %vm720_vm9 = vcmp.eq.s32.totalorder %v1642_v35, 1  ;;  %v1781_v63 = vsel %vm768_vm5, %v1705_v0, -3e+38  ;;  %v1784_v61 = vsel %vm772_vm7, %v1707_v1, -3e+38  ;;  %vm2138_vm6 = vcmp.eq.s32.totalorder %v1575_v8, 1 }
 0x142   :  { %v1789_v28 = vsel %vm2138_vm6, %v1705_v0, -3e+38  ;;  %vm773_vm0 = vcmp.eq.s32.totalorder %v1666_v23, 1  ;;  %v1797_v16 = vsel %vm490_vm11, %v1707_v1, -3e+38  ;;  %vm2139_vm11 = vcmp.eq.s32.totalorder %v1623_v54, 1 }
 0x143   :  { %v1802_v11 = vsel %vm539_vm12, %v1705_v0, -3e+38  ;;  %v1807_v8 = vsel %vm543_vm13, %v1707_v1, -3e+38  ;;  %v1809_v32 = vpop.f32.mrf.mxu2  ;;  %v1811_v51 = vpop.f32.mrf.mxu3  ;;  %v1820_v33 = vsel %vm2139_vm11, %v1705_v0, -3e+38  ;;  %v2144_v35 = vmax.f32 %v1752_v30, %v1757_v42 }
 0x144   :  { %vm2140_vm12 = vcmp.eq.s32.totalorder %v1633_v14, 1  ;;  %vm821_vm13 = vcmp.eq.s32.totalorder %v805_v36, 1  ;;  %v828_v18 = vsel %vm822_vm8, %v1809_v32, -3e+38  ;;  %v832_v3 = vsel %vm826_vm4, %v1811_v51, -3e+38 }
 0x145   :  { %v1825_v34 = vsel %vm2140_vm12, %v1707_v1, -3e+38  ;;  %vm716_vm14 = vcmp.eq.s32.totalorder %v1669_v25, 1  ;;  %v834_v54 = vmax.f32 %v828_v18, %v832_v3  ;;  %vm2141_vm5 = vcmp.eq.s32.totalorder %v1445_v57, 1  ;;  %v817_v13 = vpop.permute.xlu1 %816 }
 0x146   :  { %v281_v14 = vsel %vm2141_vm5, %v1809_v32, -3e+38  ;;  %vm2142_vm6 = vcmp.eq.s32.totalorder %v1418_v44, 1  ;;  %vm276_vm7 = vcmp.eq.s32.totalorder %v1410_v40, 1  ;;  %vm329_vm8 = vcmp.eq.s32.totalorder %v1430_v50, 1  ;;  %v1843_v22 = vpop.permute.xlu0 %813  ;;  %v1869_v36 = vpop.permute.xlu2 %916 }
 0x147   :  { %v285_v53 = vsel %vm2142_vm6, %v1811_v51, -3e+38  ;;  %v334_v18 = vsel %vm328_vm1, %v1809_v32, -3e+38  ;;  %v338_v57 = vsel %vm332_vm15, %v1811_v51, -3e+38  ;;  %v2145_v23 = vmax.f32 %v1771_v38, %v1775_v2 }
 0x148   :  { %v287_v26 = vmax.f32 %v281_v14, %v285_v53  ;;  %v387_v44 = vsel %vm381_vm10, %v1809_v32, -3e+38  ;;  %vm382_vm4 = vcmp.eq.s32.totalorder %v1454_v62, 1  ;;  %vm435_vm11 = vcmp.eq.s32.totalorder %v1487_v29, 1 }
 0x149   :  { %v827_v3 = vsel %vm821_vm13, %v1705_v0, -3e+38  ;;  %vm825_vm12 = vcmp.eq.s32.totalorder %v817_v13, 1  ;;  %v340_v53 = vmax.f32 %v334_v18, %v338_v57  ;;  %v391_v15 = vsel %vm385_vm2, %v1811_v51, -3e+38 }
 0x14a   :  { %vm491_vm1 = vcmp.eq.s32.totalorder %v1544_v48, 1  ;;  %v831_v56 = vsel %vm825_vm12, %v1707_v1, -3e+38  ;;  %v1863_v14 = vmax.f32 %v286_v58, %v287_v26  ;;  %v393_v41 = vmax.f32 %v387_v44, %v391_v15 }
 0x14b   :  { %v440_v19 = vsel %vm434_vm3, %v1809_v32, -3e+38  ;;  %vm544_vm10 = vcmp.eq.s32.totalorder %v1570_v6, 1  ;;  %v833_v13 = vmax.f32 %v827_v3, %v831_v56  ;;  %v1871_v18 = vmax.f32 %v339_v17, %v340_v53  ;;  %v1890_v17 = vpop.f32.mrf.mxu2 }
 0x14c   :  { %vm2143_vm15 = vcmp.eq.s32.totalorder %v1512_v37, 1  ;;  %v722_v26 = vsel %vm716_vm14, %v1809_v32, -3e+38  ;;  %vm769_vm2 = vcmp.eq.s32.totalorder %v1684_v24, 1  ;;  %v1880_v58 = vmax.f32 %v392_v45, %v393_v41 }
 0x14d   :  { %v444_v10 = vsel %vm2143_vm15, %v1811_v51, -3e+38  ;;  %v726_v57 = vsel %vm720_vm9, %v1811_v51, -3e+38  ;;  %vm277_vm3 = vcmp.eq.s32.totalorder %v1460_v4, 1  ;;  %v1888_v37 = vmax.f32 %v833_v13, %v834_v54  ;;  %v861_v44 = vpop.permute.xlu1 %860 }
 0x14e   :  { %v446_v49 = vmax.f32 %v440_v19, %v444_v10  ;;  %v728_v25 = vmax.f32 %v722_v26, %v726_v57  ;;  %v775_v24 = vsel %vm769_vm2, %v1809_v32, -3e+38  ;;  %v779_v45 = vsel %vm773_vm0, %v1811_v51, -3e+38  ;;  %v858_v42 = vpop.permute.xlu0 %857 }
 0x14f   :  { %vm487_vm14 = vcmp.eq.s32.totalorder %v1573_v7, 1  ;;  %vm540_vm9 = vcmp.eq.s32.totalorder %v1597_v27, 1  ;;  %vm717_vm6 = vcmp.eq.s32.totalorder %v1630_v9, 1  ;;  %vm770_vm15 = vcmp.eq.s32.totalorder %v1654_v60, 1  ;;  %v1947_v9 = vpop.permute.xlu2 %925 }
 0x150   :  { %v447_v19 = vmax.f32 %v2144_v35, %v446_v49  ;;  %vm823_vm2 = vcmp.eq.s32.totalorder %v1678_v47, 1  ;;  %vm879_vm5 = vcmp.eq.s32.totalorder %v1761_v52, 1  ;;  %v729_v54 = vmax.f32 %v2145_v23, %v728_v25 }
 0x151   :  { %vm876_vm13 = vcmp.eq.s32.totalorder %v1686_v12, 1  ;;  %v885_v30 = vsel %vm879_vm5, %v1811_v51, -3e+38  ;;  %v781_v3 = vmax.f32 %v775_v24, %v779_v45  ;;  %vm771_vm12 = vcmp.eq.s32.totalorder %v1688_v20, 1 }
 0x152   :  { %v282_v53 = vsel %vm276_vm7, %v1890_v17, -3e+38  ;;  %v335_v52 = vsel %vm329_vm8, %v1890_v17, -3e+38  ;;  %v493_v38 = vsel %vm487_vm14, %v1809_v32, -3e+38  ;;  %v2146_v40 = vmax.f32 %v1781_v63, %v1784_v61 }
 0x153   :  { %vm875_vm0 = vcmp.eq.s32.totalorder %v861_v44, 1  ;;  %v388_v2 = vsel %vm382_vm4, %v1890_v17, -3e+38  ;;  %v441_v15 = vsel %vm435_vm11, %v1890_v17, -3e+38  ;;  %vm824_vm7 = vcmp.eq.s32.totalorder %v1843_v22, 1  ;;  %v1950_v48 = vpop.f32.mrf.mxu2 }
 0x154   :  { %v782_v56 = vmax.f32 %v2146_v40, %v781_v3  ;;  %v723_v50 = vsel %vm717_vm6, %v1890_v17, -3e+38  ;;  %v497_v7 = vsel %vm491_vm1, %v1811_v51, -3e+38  ;;  %v546_v62 = vsel %vm540_vm9, %v1809_v32, -3e+38 }
 0x155   :  { %vm874_vm8 = vcmp.eq.s32.totalorder %v858_v42, 1  ;;  %v776_v29 = vsel %vm770_vm15, %v1890_v17, -3e+38  ;;  %v499_v63 = vmax.f32 %v493_v38, %v497_v7  ;;  %v550_v61 = vsel %vm544_vm10, %v1811_v51, -3e+38  ;;  %v870_v45 = vpop.permute.xlu1 %869 }
 0x156   :  { %v881_v41 = vsel %vm875_vm0, %v1809_v32, -3e+38  ;;  %v829_v27 = vsel %vm823_vm2, %v1890_v17, -3e+38  ;;  %v1958_v60 = vsel %vm876_vm13, %v1890_v17, -3e+38  ;;  %v552_v13 = vmax.f32 %v546_v62, %v550_v61  ;;  %v867_v35 = vpop.permute.xlu0 %866 }
 0x157   :  { %v283_v6 = vsel %vm277_vm3, %v1950_v48, -3e+38  ;;  %vm2147_vm4 = vcmp.eq.s32.totalorder %v1499_v31, 1  ;;  %vm2148_vm11 = vcmp.eq.s32.totalorder %v1535_v46, 1  ;;  %v2149_v47 = vmax.f32 %v1789_v28, %v1797_v16  ;;  %v1996_v61 = vpop.permute.xlu2 %969 }
 0x158   :  { %v336_v10 = vsel %vm2147_vm4, %v1950_v48, -3e+38  ;;  %v389_v26 = vsel %vm2148_vm11, %v1950_v48, -3e+38  ;;  %v880_v12 = vsel %vm874_vm8, %v1705_v0, -3e+38  ;;  %v289_v57 = vmax.f32 %v282_v53, %v283_v6 }
 0x159   :  { %v1972_v49 = vmax.f32 %v2149_v47, %v499_v63  ;;  %v342_v25 = vmax.f32 %v335_v52, %v336_v10  ;;  %v395_v24 = vmax.f32 %v388_v2, %v389_v26  ;;  %v887_v4 = vmax.f32 %v881_v41, %v885_v30 }
 0x15a   :  { %vm2150_vm1 = vcmp.eq.s32.totalorder %v1563_v59, 1  ;;  %vm2151_vm10 = vcmp.eq.s32.totalorder %v1680_v5, 1  ;;  %v2152_v28 = vmax.f32 %v1802_v11, %v1807_v8  ;;  %vm878_vm3 = vcmp.eq.s32.totalorder %v870_v45, 1 }
 0x15b   :  { %v442_v31 = vsel %vm2150_vm1, %v1950_v48, -3e+38  ;;  %v724_v46 = vsel %vm2151_vm10, %v1950_v48, -3e+38  ;;  %v290_v23 = vmax.f32 %v1863_v14, %v289_v57  ;;  %v343_v44 = vmax.f32 %v1871_v18, %v342_v25 }
 0x15c   :  { %v1984_v16 = vmax.f32 %v2152_v28, %v552_v13  ;;  %v396_v30 = vmax.f32 %v1880_v58, %v395_v24  ;;  %v884_v42 = vsel %vm878_vm3, %v1707_v1, -3e+38  ;;  %v448_v59 = vmax.f32 %v441_v15, %v442_v31 }
 0x15d   :  { %v730_v3 = vmax.f32 %v723_v50, %v724_v46  ;;  %v777_v5 = vsel %vm771_vm12, %v1950_v48, -3e+38  ;;  %v886_v53 = vmax.f32 %v880_v12, %v884_v42  ;;  %v291_v52 = vrot.slane %v290_v23, 4  ;;  %v1999_v10 = vpop.permute.xlu1 %913 }
 0x15e   :  { %v344_v11 = vrot.slane %v343_v44, 4  ;;  %v397_v8 = vrot.slane %v396_v30, 4  ;;  %vm668_vm13 = vcmask 1040384   ;;  %v449_v38 = vmax.f32 %v447_v19, %v448_v59  ;;  %v2001_v26 = vpop.permute.xlu0 %910 }
 0x15f   :  { %v731_v2 = vmax.f32 %v729_v54, %v730_v3  ;;  %v783_v14 = vmax.f32 %v776_v29, %v777_v5  ;;  %v830_v18 = vsel %vm824_vm7, %v1950_v48, -3e+38  ;;  %v888_v58 = vmax.f32 %v886_v53, %v887_v4 }
 0x160   :  { %vm670_vm5 = vcmask 1041408   ;;  %v292_v15 = vmax.f32 %v290_v23, %v291_v52  ;;  %v345_v40 = vmax.f32 %v343_v44, %v344_v11  ;;  %v398_v50 = vmax.f32 %v396_v30, %v397_v8 }
 0x161   :  { %v450_v7 = vrot.slane %v449_v38, 4  ;;  %v732_v20 = vrot.slane %v731_v2, 4  ;;  %v784_v62 = vmax.f32 %v782_v56, %v783_v14  ;;  %v836_v63 = vmax.f32 %v829_v27, %v830_v18 }
 0x162   :  { %v293_v41 = vrot.slane %v292_v15, 2  ;;  %v346_v13 = vrot.slane %v345_v40, 2  ;;  %v399_v19 = vrot.slane %v398_v50, 2  ;;  %vm877_vm14 = vcmp.eq.s32.totalorder %v867_v35, 1 }
 0x163   :  { %v451_v54 = vmax.f32 %v449_v38, %v450_v7  ;;  %v733_v29 = vmax.f32 %v731_v2, %v732_v20  ;;  %v785_v6 = vrot.slane %v784_v62, 4  ;;  %v837_v22 = vmax.f32 %v1888_v37, %v836_v63 }
 0x164   :  { %v294_v47 = vmax.f32 %v292_v15, %v293_v41  ;;  %v347_v12 = vmax.f32 %v345_v40, %v346_v13  ;;  %v400_v57 = vmax.f32 %v398_v50, %v399_v19  ;;  %v883_v56 = vsel %vm877_vm14, %v1950_v48, -3e+38 }
 0x165   :  { %v452_v27 = vrot.slane %v451_v54, 2  ;;  %v734_v25 = vrot.slane %v733_v29, 2  ;;  %v786_v24 = vmax.f32 %v784_v62, %v785_v6  ;;  %v838_v4 = vrot.slane %v837_v22, 4  ;;  %v2007_v15 = vpop.permute.xlu1 %922 }
 0x166   :  { %v295_v45 = vrot.slane %v294_v47, 1  ;;  %v348_v35 = vrot.slane %v347_v12, 1  ;;  %v401_v31 = vrot.slane %v400_v57, 1  ;;  %v889_v46 = vmax.f32 %v1958_v60, %v883_v56  ;;  %v2009_v40 = vpop.permute.xlu0 %919 }
 0x167   :  { %v453_v28 = vmax.f32 %v451_v54, %v452_v27  ;;  %v735_v37 = vmax.f32 %v733_v29, %v734_v25  ;;  %v787_v23 = vrot.slane %v786_v24, 2  ;;  %v839_v44 = vmax.f32 %v837_v22, %v838_v4 }
 0x168   :  { %v296_v30 = vmax.f32 %v294_v47, %v295_v45  ;;  %v349_v42 = vmax.f32 %v347_v12, %v348_v35  ;;  %v402_v59 = vmax.f32 %v400_v57, %v401_v31  ;;  %v890_v3 = vmax.f32 %v888_v58, %v889_v46  ;;  %v2011_v58 = vpop.permute.xlu2 %978  ;;  %v2153_v12 = vld [vmem:[#allocation9_spill] sm:$0xff]  ;;  %v2154_v57 = vld [vmem:[#allocation12_spill] sm:$0xff] }
 0x169   :  { %v454_v5 = vrot.slane %v453_v28, 1  ;;  %v736_v53 = vrot.slane %v735_v37, 1  ;;  %v788_v52 = vmax.f32 %v786_v24, %v787_v23  ;;  %v840_v11 = vrot.slane %v839_v44, 2  ;;  %v2156_v31 = vld [vmem:[#allocation13_spill] sm:$0xff] }
 0x16a   :  { %vm672_vm9 = vcmask 1042432   ;;  %v669_v8 = vsel %vm668_vm13, %v296_v30, %v349_v42  ;;  %v891_v38 = vrot.slane %v890_v3, 4  ;;  %vm488_vm6 = vcmp.eq.s32.totalorder %v1530_v39, 1 }
 0x16b   :  { %v455_v2 = vmax.f32 %v453_v28, %v454_v5  ;;  %v671_v14 = vsel %vm670_vm5, %v669_v8, %v402_v59  ;;  %v737_v60 = vmax.f32 %v735_v37, %v736_v53  ;;  %v789_v18 = vrot.slane %v788_v52, 1  ;;  %v2157_v59 = vld [vmem:[#allocation15_spill] sm:$0xff]  ;;  %v2158_v53 = vld [vmem:[#allocation16_spill] sm:$0xff] }
 0x16c   :  { %v841_v50 = vmax.f32 %v839_v44, %v840_v11  ;;  %v892_v7 = vmax.f32 %v890_v3, %v891_v38  ;;  %vm489_vm12 = vcmp.eq.s32.totalorder %v1587_v21, 1  ;;  %v494_v19 = vsel %vm488_vm6, %v1890_v17, -3e+38 }
 0x16d   :  { %v2014_v20 = vsel %vm672_vm9, %v671_v14, %v455_v2  ;;  %v790_v62 = vmax.f32 %v788_v52, %v789_v18  ;;  %v495_v54 = vsel %vm489_vm12, %v1950_v48, -3e+38  ;;  %vm541_vm15 = vcmp.eq.s32.totalorder %v1558_v55, 1  ;;  %v2027_v56 = vpop.permute.xlu1 %966  ;;  %v2160_v2 = vld [vmem:[#allocation11_spill] sm:$0xff]  ;;  %v2162_v18 = vld [vmem:[#allocation17_spill] sm:$0xff] }
 0x16e   :  { %v842_v63 = vrot.slane %v841_v50, 1  ;;  %v893_v41 = vrot.slane %v892_v7, 2  ;;  %v501_v22 = vmax.f32 %v494_v19, %v495_v54  ;;  %vm542_vm2 = vcmp.eq.s32.totalorder %v1611_v43, 1  ;;  %v2029_v27 = vpop.permute.xlu0 %963  ;;  %v2163_v54 = vld [vmem:[#allocation10_spill] sm:$0xff] }
 0x16f   :  { %v1109_v13 = vsel %vm668_vm13, %v737_v60, %v790_v62  ;;  %vm597_vm0 = vcmp.eq.s32.totalorder %v2153_v12, 1  ;;  %vm593_vm7 = vcmp.eq.s32.totalorder %v2154_v57, 1  ;;  %v547_v25 = vsel %vm541_vm15, %v1890_v17, -3e+38 }
 0x170   :  { %v843_v29 = vmax.f32 %v841_v50, %v842_v63  ;;  %v894_v6 = vmax.f32 %v892_v7, %v893_v41  ;;  %v502_v21 = vmax.f32 %v1972_v49, %v501_v22  ;;  %v548_v24 = vsel %vm542_vm2, %v1950_v48, -3e+38  ;;  %v2155_v49 = vld [vmem:[#allocation8_spill] sm:$0xff]  ;;  %v2040_v28 = vpop.permute.xlu2 %1028 }
 0x171   :  { %v599_v43 = vsel %vm593_vm7, %v1809_v32, -3e+38  ;;  %v603_v45 = vsel %vm597_vm0, %v1811_v51, -3e+38  ;;  %v554_v35 = vmax.f32 %v547_v25, %v548_v24  ;;  %vm594_vm8 = vcmp.eq.s32.totalorder %v2155_v49, 1 }
 0x172   :  { %v895_v47 = vrot.slane %v894_v6, 1  ;;  %v1110_v39 = vsel %vm670_vm5, %v1109_v13, %v843_v29  ;;  %v503_v4 = vrot.slane %v502_v21, 4  ;;  %vm595_vm4 = vcmp.eq.s32.totalorder %v2156_v31, 1 }
 0x173   :  { %v555_v23 = vmax.f32 %v1984_v16, %v554_v35  ;;  %v600_v44 = vsel %vm594_vm8, %v1890_v17, -3e+38  ;;  %v601_v30 = vsel %vm595_vm4, %v1950_v48, -3e+38  ;;  %v605_v42 = vmax.f32 %v599_v43, %v603_v45  ;;  %v2161_v16 = vld [vmem:[#allocation14_spill] sm:$0xff] }
 0x174   :  { %v896_v55 = vmax.f32 %v894_v6, %v895_v47  ;;  %v504_v37 = vmax.f32 %v502_v21, %v503_v4  ;;  %vm645_vm11 = vcmp.eq.s32.totalorder %v2157_v59, 1  ;;  %v607_v5 = vmax.f32 %v600_v44, %v601_v30 }
 0x175   :  { %vm649_vm1 = vcmp.eq.s32.totalorder %v2158_v53, 1  ;;  %v556_v52 = vrot.slane %v555_v23, 4  ;;  %v2159_v11 = vmax.f32 %v1820_v33, %v1825_v34  ;;  %v651_v38 = vsel %vm645_vm11, %v1705_v0, -3e+38  ;;  %v976_v50 = vpop.permute.xlu1 %975 }
 0x176   :  { %v2038_v46 = vsel %vm672_vm9, %v1110_v39, %v896_v55  ;;  %v505_v3 = vrot.slane %v504_v37, 2  ;;  %vm650_vm10 = vcmp.eq.s32.totalorder %v2160_v2, 1  ;;  %vm646_vm3 = vcmp.eq.s32.totalorder %v2161_v16, 1  ;;  %v2055_v7 = vpop.permute.xlu0 %972 }
 0x177   :  { %v606_v8 = vmax.f32 %v2159_v11, %v605_v42  ;;  %v655_v60 = vsel %vm649_vm1, %v1707_v1, -3e+38  ;;  %vm648_vm13 = vcmp.eq.s32.totalorder %v2162_v18, 1  ;;  %v557_v62 = vmax.f32 %v555_v23, %v556_v52 }
 0x178   :  { %v506_v14 = vmax.f32 %v504_v37, %v505_v3  ;;  %v652_v41 = vsel %vm646_vm3, %v1809_v32, -3e+38  ;;  %v654_v34 = vsel %vm648_vm13, %v1950_v48, -3e+38  ;;  %v656_v13 = vsel %vm650_vm10, %v1811_v51, -3e+38  ;;  %v2065_v25 = vpop.permute.xlu2 %1072 }
 0x179   :  { %v608_v63 = vmax.f32 %v606_v8, %v607_v5  ;;  %v657_v19 = vmax.f32 %v651_v38, %v655_v60  ;;  %vm647_vm5 = vcmp.eq.s32.totalorder %v2163_v54, 1  ;;  %vm674_vm14 = vcmask 1043456  }
 0x17a   :  { %v507_v33 = vrot.slane %v506_v14, 1  ;;  %v558_v29 = vrot.slane %v557_v62, 2  ;;  %v653_v47 = vsel %vm647_vm5, %v1890_v17, -3e+38  ;;  %v658_v21 = vmax.f32 %v652_v41, %v656_v13 }
 0x17b   :  { %v609_v22 = vrot.slane %v608_v63, 4  ;;  %v660_v12 = vmax.f32 %v653_v47, %v654_v34  ;;  %vm932_vm9 = vcmp.eq.s32.totalorder %v1947_v9, 1  ;;  %vm928_vm6 = vcmp.eq.s32.totalorder %v1999_v10, 1 }
 0x17c   :  { %v508_v6 = vmax.f32 %v506_v14, %v507_v33  ;;  %v559_v39 = vmax.f32 %v557_v62, %v558_v29  ;;  %vm931_vm12 = vcmp.eq.s32.totalorder %v2007_v15, 1  ;;  %v659_v55 = vmax.f32 %v657_v19, %v658_v21 }
 0x17d   :  { %v610_v24 = vmax.f32 %v608_v63, %v609_v22  ;;  %v938_v45 = vsel %vm932_vm9, %v1811_v51, -3e+38  ;;  %vm927_vm15 = vcmp.eq.s32.totalorder %v2001_v26, 1  ;;  %vm984_vm2 = vcmp.eq.s32.totalorder %v976_v50, 1  ;;  %v2071_v35 = vpop.permute.xlu1 %1019 }
 0x17e   :  { %v675_v57 = vsel %vm674_vm14, %v2014_v20, %v508_v6  ;;  %v560_v4 = vrot.slane %v559_v39, 1  ;;  %v2073_v9 = vpop.permute.xlu0 %1016  ;;  %v661_v20 = vmax.f32 %v659_v55, %v660_v12  ;;  %vm985_vm0 = vcmp.eq.s32.totalorder %v2011_v58, 1 }
 0x17f   :  { %v611_v43 = vrot.slane %v610_v24, 2  ;;  %v934_v49 = vsel %vm928_vm6, %v1809_v32, -3e+38  ;;  %v937_v10 = vsel %vm931_vm12, %v1707_v1, -3e+38  ;;  %vm981_vm7 = vcmp.eq.s32.totalorder %v2027_v56, 1 }
 0x180   :  { %vm980_vm8 = vcmp.eq.s32.totalorder %v2029_v27, 1  ;;  %vm676_vm4 = vcmask 1044480   ;;  %v662_v31 = vrot.slane %v661_v20, 4  ;;  %v933_v26 = vsel %vm927_vm15, %v1705_v0, -3e+38  ;;  %v1023_v8 = vpop.permute.xlu2 %1022 }
 0x181   :  { %v612_v15 = vmax.f32 %v610_v24, %v611_v43  ;;  %v990_v37 = vsel %vm984_vm2, %v1707_v1, -3e+38  ;;  %v561_v23 = vmax.f32 %v559_v39, %v560_v4  ;;  %v939_v30 = vmax.f32 %v933_v26, %v937_v10 }
 0x182   :  { %vm930_vm11 = vcmp.eq.s32.totalorder %v2009_v40, 1  ;;  %vm678_vm1 = vcmask 1045504   ;;  %v663_v42 = vmax.f32 %v661_v20, %v662_v31  ;;  %v987_v59 = vsel %vm981_vm7, %v1809_v32, -3e+38 }
 0x183   :  { %v613_v44 = vrot.slane %v612_v15, 1  ;;  %v986_v3 = vsel %vm980_vm8, %v1705_v0, -3e+38  ;;  %v677_v27 = vsel %vm676_vm4, %v675_v57, %v561_v23  ;;  %v940_v5 = vmax.f32 %v934_v49, %v938_v45 }
 0x184   :  { %v992_v53 = vmax.f32 %v986_v3, %v990_v37  ;;  %vm983_vm10 = vcmp.eq.s32.totalorder %v2055_v7, 1  ;;  %v664_v52 = vrot.slane %v663_v42, 2  ;;  %vm929_vm3 = vcmp.eq.s32.totalorder %v1869_v36, 1 }
 0x185   :  { %v614_v56 = vmax.f32 %v612_v15, %v613_v44  ;;  %v991_v40 = vsel %vm985_vm0, %v1811_v51, -3e+38  ;;  %v936_v11 = vsel %vm930_vm11, %v1950_v48, -3e+38  ;;  %vm982_vm13 = vcmp.eq.s32.totalorder %v1996_v61, 1  ;;  %v1070_v14 = vpop.permute.xlu1 %1069 }
 0x186   :  { %v941_v2 = vmax.f32 %v939_v30, %v940_v5  ;;  %v993_v16 = vmax.f32 %v987_v59, %v991_v40  ;;  %v1032_v60 = vpop.permute.xlu0 %1031  ;;  %v665_v18 = vmax.f32 %v663_v42, %v664_v52  ;;  %v935_v50 = vsel %vm929_vm3, %v1890_v17, -3e+38 }
 0x187   :  { %v679_v38 = vsel %vm678_vm1, %v677_v27, %v614_v56  ;;  %v989_v36 = vsel %vm983_vm10, %v1950_v48, -3e+38  ;;  %v942_v7 = vmax.f32 %v935_v50, %v936_v11  ;;  %v988_v63 = vsel %vm982_vm13, %v1890_v17, -3e+38 }
 0x188   :  { %v994_v62 = vmax.f32 %v992_v53, %v993_v16  ;;  %v666_v58 = vrot.slane %v665_v18, 1  ;;  %vm680_vm5 = vcmask 1046528   ;;  %v995_v33 = vmax.f32 %v988_v63, %v989_v36  ;;  %v1079_v47 = vpop.permute.xlu2 %1078 }
 0x189   :  { %v943_v41 = vmax.f32 %v941_v2, %v942_v7  ;;  %vm1038_vm6 = vcmp.eq.s32.totalorder %v1032_v60, 1  ;;  %vm1087_vm2 = vcmp.eq.s32.totalorder %v2065_v25, 1  ;;  %vm1034_vm0 = vcmp.eq.s32.totalorder %v2071_v35, 1 }
 0x18a   :  { %v667_v34 = vmax.f32 %v665_v18, %v666_v58  ;;  %v996_v13 = vmax.f32 %v994_v62, %v995_v33  ;;  %vm1033_vm7 = vcmp.eq.s32.totalorder %v2073_v9, 1  ;;  %vm1086_vm8 = vcmp.eq.s32.totalorder %v1070_v14, 1 }
 0x18b   :  { %v944_v19 = vrot.slane %v943_v41, 4  ;;  %v1044_v21 = vsel %vm1038_vm6, %v1811_v51, -3e+38  ;;  %vm1037_vm11 = vcmp.eq.s32.totalorder %v2040_v28, 1  ;;  %v1093_v24 = vsel %vm1087_vm2, %v1809_v32, -3e+38 }
 0x18c   :  { %v681_v61 = vsel %vm680_vm5, %v679_v38, %v667_v34  ;;  %v997_v22 = vrot.slane %v996_v13, 4  ;;  %vm1035_vm10 = vcmp.eq.s32.totalorder %v1023_v8, 1  ;;  %vm1089_vm3 = vcmp.eq.s32.totalorder %v1079_v47, 1 }
 0x18d   :  { %vm682_vm9 = vcmp.gt.f32.partialorder %v681_v61, -1.5e+38  ;;  %v1085_v54 = vpop.permute.xlu1 %1084  ;;  %v945_v39 = vmax.f32 %v943_v41, %v944_v19  ;;  %v1040_v55 = vsel %vm1034_vm0, %v1809_v32, -3e+38  ;;  %v1039_v4 = vsel %vm1033_vm7, %v1705_v0, -3e+38 }
 0x18e   :  { %v1082_v29 = vpop.permute.xlu0 %1081  ;;  %v683_v6 = vsel %vm682_vm9, %v681_v61, 0.0  ;;  %vm1091_vm12 = vcmp.eq.s32.totalorder %v1085_v54, 1  ;;  %v998_v25 = vmax.f32 %v996_v13, %v997_v22  ;;  %v1092_v43 = vsel %vm1086_vm8, %v1705_v0, -3e+38 }
 0x18f   :  { %vm1090_vm15 = vcmp.eq.s32.totalorder %v1082_v29, 1  ;;  %684 = vst [vmem:[#allocation5] sm:$0xff] %v683_v6  ;;  %v1097_v12 = vsel %vm1091_vm12, %v1811_v51, -3e+38  ;;  %v1046_v45 = vmax.f32 %v1040_v55, %v1044_v21  ;;  %v1043_v51 = vsel %vm1037_vm11, %v1707_v1, -3e+38 }
 0x190   :  { %v1096_v57 = vsel %vm1090_vm15, %v1707_v1, -3e+38  ;;  %v1099_v35 = vmax.f32 %v1093_v24, %v1097_v12  ;;  %v946_v20 = vrot.slane %v945_v39, 2  ;;  %v1041_v49 = vsel %vm1035_vm10, %v1890_v17, -3e+38 }
 0x191   :  { %v1098_v9 = vmax.f32 %v1092_v43, %v1096_v57  ;;  %v1095_v15 = vsel %vm1089_vm3, %v1950_v48, -3e+38  ;;  %v1045_v31 = vmax.f32 %v1039_v4, %v1043_v51  ;;  %v999_v32 = vrot.slane %v998_v25, 2 }
 0x192   :  { %v947_v1 = vmax.f32 %v945_v39, %v946_v20 }
 0x193   :  { %v1047_v37 = vmax.f32 %v1045_v31, %v1046_v45  ;;  %v1100_v23 = vmax.f32 %v1098_v9, %v1099_v35  ;;  %v1000_v3 = vmax.f32 %v998_v25, %v999_v32 }
 0x194   :  { %v948_v5 = vrot.slane %v947_v1, 1 }
 0x195   :  { %v1076_v28 = vpop.permute.xlu1 %1075  ;;  %v1001_v40 = vrot.slane %v1000_v3, 1 }
 0x196   :  { %v1026_v10 = vpop.permute.xlu0 %1025  ;;  %vm1088_vm13 = vcmp.eq.s32.totalorder %v1076_v28, 1  ;;  %v949_v38 = vmax.f32 %v947_v1, %v948_v5 }
 0x197   :  { %vm1036_vm9 = vcmp.eq.s32.totalorder %v1026_v10, 1  ;;  %v1094_v26 = vsel %vm1088_vm13, %v1890_v17, -3e+38 }
 0x198   :  { %v1042_v0 = vsel %vm1036_vm9, %v1950_v48, -3e+38  ;;  %v1101_v44 = vmax.f32 %v1094_v26, %v1095_v15  ;;  %v1002_v48 = vmax.f32 %v1000_v3, %v1001_v40  ;;  %v1112_v60 = vsel %vm674_vm14, %v2038_v46, %v949_v38 }
 0x199   :  { %v1048_v30 = vmax.f32 %v1041_v49, %v1042_v0 }
 0x19a   :  { %v1102_v42 = vmax.f32 %v1100_v23, %v1101_v44  ;;  %v1113_v36 = vsel %vm676_vm4, %v1112_v60, %v1002_v48 }
 0x19b   :  { %v1049_v59 = vmax.f32 %v1047_v37, %v1048_v30 }
 0x19c   :  { %v1103_v56 = vrot.slane %v1102_v42, 4 }
 0x19d   :  { %v1050_v27 = vrot.slane %v1049_v59, 4 }
 0x19e   :  { %v1104_v53 = vmax.f32 %v1102_v42, %v1103_v56 }
 0x19f   :  { %v1051_v52 = vmax.f32 %v1049_v59, %v1050_v27 }
 0x1a0   :  { %v1105_v11 = vrot.slane %v1104_v53, 2 }
 0x1a1   :  { %v1052_v8 = vrot.slane %v1051_v52, 2 }
 0x1a2   :  { %v1106_v17 = vmax.f32 %v1104_v53, %v1105_v11 }
 0x1a3   :  { %v1053_v2 = vmax.f32 %v1051_v52, %v1052_v8 }
 0x1a4   :  { %v1107_v16 = vrot.slane %v1106_v17, 1 }
 0x1a5   :  { %v1054_v14 = vrot.slane %v1053_v2, 1 }
 0x1a6   :  { %v1108_v18 = vmax.f32 %v1106_v17, %v1107_v16 }
 0x1a7   :  { %v1055_v50 = vmax.f32 %v1053_v2, %v1054_v14 }
 0x1a9   :  { %v1114_v7 = vsel %vm678_vm1, %v1113_v36, %v1055_v50 }
 0x1aa   :  { %v1115_v62 = vsel %vm680_vm5, %v1114_v7, %v1108_v18 }
 0x1ab   :  { %vm1116_vm6 = vcmp.gt.f32.partialorder %v1115_v62, -1.5e+38 }
 0x1ac   :  { %v1117_v58 = vsel %vm1116_vm6, %v1115_v62, 0.0 }
 0x1ad   :  { %1118 = vst [vmem:[#allocation5 + $0x8] sm:$0xff] %v1117_v58 }
 0x1ae   :  { %1131 = dma.vmem_to_hbm [thread:$0]  %s1124_s26, 256, %s1126_s28, [#allocation4], %s1224_s29, %s1224_s29, %s1225_s30  }
 0x1af   :  { %1216 = dma.done.wait [#allocation4], 256  }
 0x1b0   :  { %1217 = vsyncadd [#allocation4], 4294967040 }
 0x1b1   :  { %1136 = vsyncpa [#allocation3], 1 }
 0x1b2   :  { %1137 = vsyncpa [#allocation4], 1 }

</bundles_post_ra>
